<compile_context>
chip_gen: v6e
topology: v6e:2x2x1
jax: 0.10.0
libtpu: 0.0.40
codegen_flags: <defaults>
</compile_context>

<pallas_src>
import functools

import numpy as np

import jax
import jax.numpy as jnp
from jax.experimental import pallas as pl
from jax.experimental.pallas import tpu as pltpu


def _round_up(x, m):
    return (x + m - 1) // m * m


def _vae_kernel(x_ref, eps_ref,
                w1_ref, b1_ref,
                w2_ref, b2_ref,
                w3_ref, b3_ref,
                w4_ref, b4_ref,
                recon_ref, mu_ref, logvar_ref, *, lp):
    x = x_ref[...]                                                   # (TB, D) f32

    # encode: h1 = relu(x @ W1 + b1)   (bf16 MXU inputs, f32 accumulate)
    h1 = jnp.dot(x.astype(jnp.bfloat16), w1_ref[...],
                 preferred_element_type=jnp.float32) + b1_ref[...]
    h1 = jnp.maximum(h1, 0.0)

    # fused mu/logvar head: one (H, 2*LP) matmul instead of two N=32 matmuls.
    stats = jnp.dot(h1.astype(jnp.bfloat16), w2_ref[...],
                    preferred_element_type=jnp.float32) + b2_ref[...]
    mu = stats[:, :lp]                                               # (TB, LP)
    logvar = stats[:, lp:]                                           # (TB, LP)

    # reparameterize: z = mu + eps * exp(0.5 * logvar)   (f32 elementwise)
    std = jnp.exp(0.5 * logvar)
    z = mu + eps_ref[...] * std

    # decode: sigmoid(relu(z @ W3 + b3) @ W4 + b4)
    h3 = jnp.dot(z.astype(jnp.bfloat16), w3_ref[...],
                 preferred_element_type=jnp.float32) + b3_ref[...]
    h3 = jnp.maximum(h3, 0.0)
    logits = jnp.dot(h3.astype(jnp.bfloat16), w4_ref[...],
                     preferred_element_type=jnp.float32) + b4_ref[...]

    recon_ref[...] = jax.nn.sigmoid(logits)
    mu_ref[...] = mu
    logvar_ref[...] = logvar


def _vmem_budget_bytes(tb, d, h, lp):
    """Estimate VMEM need: bf16 weights (x2 buffers), f32 biases, double-buffered
    I/O tiles, plus intermediate-activation headroom.  Clamp into [16, 48] MiB so
    v7x (64 MiB physical per TC) keeps headroom for Mosaic scratch."""
    w_bytes = 2 * 2 * (d * h + h * 2 * lp + lp * h + h * d)          # bf16, 2 bufs
    b_bytes = 2 * 4 * (h + 2 * lp + h + d)                            # f32, 2 bufs
    io_bytes = 2 * 4 * (tb * d + tb * lp + tb * d + 2 * tb * lp)      # 2-deep pipe
    act_bytes = 4 * (2 * tb * h + tb * 2 * lp + tb * d)               # h1/h3/stats/logits
    need = int(1.25 * (w_bytes + b_bytes + io_bytes + act_bytes))
    return int(min(max(need, 16 * 2**20), 48 * 2**20))


def vae_forward(x_flat, eps, params, *, batch_tile=128, lane_pad=128):
    """x_flat: (B, D) f32, eps: (B, L) f32, params: dict of f32 weights/biases.

    Returns (recon (B, D), mu (B, L), logvar (B, L)) in f32.
    """
    B, D = x_flat.shape
    L = eps.shape[1]
    H = params["w1"].shape[1]

    LP = _round_up(L, lane_pad)                 # lane-dense latent (>=128 lanes)
    TB = min(batch_tile, _round_up(B, 8))       # batch tile, multiple of 8
    Bp = _round_up(B, TB)
    n_tiles = Bp // TB

    # ---- pack operands (done in plain JAX; in production, pre-pack once) ----
    x_p = jnp.zeros((Bp, D), jnp.float32).at[:B].set(x_flat)
    eps_p = jnp.zeros((Bp, LP), jnp.float32).at[:B, :L].set(eps)

    w1 = params["w1"].astype(jnp.bfloat16)                              # (D, H)
    b1 = params["b1"].astype(jnp.float32)                               # (1, H)

    # fused + latent-padded encoder head: columns [0:L] -> mu, [LP:LP+L] -> logvar
    w2 = jnp.zeros((H, 2 * LP), jnp.float32)
    w2 = w2.at[:, :L].set(params["w21"]).at[:, LP:LP + L].set(params["w22"])
    w2 = w2.astype(jnp.bfloat16)
    b2 = jnp.zeros((1, 2 * LP), jnp.float32)
    b2 = b2.at[:, :L].set(params["b21"]).at[:, LP:LP + L].set(params["b22"])

    # decoder fc3 with zero-padded latent rows (padded z lanes contribute nothing)
    w3 = jnp.zeros((LP, H), jnp.float32).at[:L].set(params["w3"]).astype(jnp.bfloat16)
    b3 = params["b3"].astype(jnp.float32)
    w4 = params["w4"].astype(jnp.bfloat16)                              # (H, D)
    b4 = params["b4"].astype(jnp.float32)

    operands = (x_p, eps_p, w1, b1, w2, b2, w3, b3, w4, b4)

    def batched(cols):
        return pl.BlockSpec((TB, cols), lambda i: (i, 0))

    def resident(arr):
        return pl.BlockSpec(arr.shape, lambda i, _n=arr.ndim: (0,) * _n)

    in_specs = [
        batched(D),            # x
        batched(LP),           # eps
        resident(w1), resident(b1),
        resident(w2), resident(b2),
        resident(w3), resident(b3),
        resident(w4), resident(b4),
    ]
    out_shapes = (
        jax.ShapeDtypeStruct((Bp, D), jnp.float32),    # recon
        jax.ShapeDtypeStruct((Bp, LP), jnp.float32),   # mu (lane-padded)
        jax.ShapeDtypeStruct((Bp, LP), jnp.float32),   # logvar (lane-padded)
    )
    out_specs = (batched(D), batched(LP), batched(LP))

    kernel = functools.partial(_vae_kernel, lp=LP)

    recon, mu, logvar = pl.pallas_call(
        kernel,
        out_shape=out_shapes,
        grid=(n_tiles,),
        in_specs=in_specs,
        out_specs=out_specs,
        compiler_params=pltpu.CompilerParams(
            dimension_semantics=("parallel",),
            vmem_limit_bytes=_vmem_budget_bytes(TB, D, H, LP),
        ),
    )(*operands)

    return recon[:B], mu[:B, :L], logvar[:B, :L]


def init_params(key, in_dim, hidden, latent):
    """Deterministic init mimicking nn.Linear default (uniform +/-1/sqrt(fan_in)).
    Weights are stored transposed vs. PyTorch: (fan_in, fan_out) so the kernel
    computes x @ W."""
    def linear(k, fan_in, fan_out):
        kw, kb = jax.random.split(k)
        bound = 1.0 / jnp.sqrt(fan_in)
        w = jax.random.uniform(kw, (fan_in, fan_out), jnp.float32, -bound, bound)
        b = jax.random.uniform(kb, (1, fan_out), jnp.float32, -bound, bound)
        return w, b

    k1, k21, k22, k3, k4 = jax.random.split(key, 5)
    w1, b1 = linear(k1, in_dim, hidden)
    w21, b21 = linear(k21, hidden, latent)
    w22, b22 = linear(k22, hidden, latent)
    w3, b3 = linear(k3, latent, hidden)
    w4, b4 = linear(k4, hidden, in_dim)
    return dict(w1=w1, b1=b1, w21=w21, b21=b21, w22=w22, b22=b22,
                w3=w3, b3=b3, w4=w4, b4=b4)


def reference_forward(x_flat, eps, p):
    """Plain-JAX f32 reference for numerical sanity check."""
    h1 = jnp.maximum(x_flat @ p["w1"] + p["b1"], 0.0)
    mu = h1 @ p["w21"] + p["b21"]
    logvar = h1 @ p["w22"] + p["b22"]
    z = mu + eps * jnp.exp(0.5 * logvar)
    h3 = jnp.maximum(z @ p["w3"] + p["b3"], 0.0)
    recon = jax.nn.sigmoid(h3 @ p["w4"] + p["b4"])
    return recon, mu, logvar


if __name__ == "__main__":
    # Small but structurally faithful sizes: img_size=16 (D = 16*16*3 = 768),
    # hidden=256, latent=32, batch=4.  (Real module uses img_size=84.)
    img_size = 16
    latent_size = 32
    hidden_size = 256
    batch = 4
    D = img_size * img_size * 3

    key = jax.random.PRNGKey(0)
    k_params, k_x, k_eps = jax.random.split(key, 3)

    params = init_params(k_params, D, hidden_size, latent_size)

    # Input like the PyTorch module: NCHW image, flattened to (B, 3*H*W).
    x_img = jax.random.uniform(k_x, (batch, 3, img_size, img_size), jnp.float32)
    x_flat = x_img.reshape(batch, D)

    # eps ~ N(0, 1), sampled outside the kernel (torch.randn_like equivalent).
    eps = jax.random.normal(k_eps, (batch, latent_size), jnp.float32)

    recon, mu, logvar = jax.block_until_ready(vae_forward(x_flat, eps, params))

    # Sanity check against a pure-JAX f32 reference (bf16 matmul inputs in the
    # kernel => loosened tolerances).
    r_recon, r_mu, r_logvar = reference_forward(x_flat, eps, params)
    assert recon.shape == (batch, D)
    assert mu.shape == (batch, latent_size)
    assert logvar.shape == (batch, latent_size)
    assert jnp.allclose(recon, r_recon, atol=5e-2, rtol=5e-2)
    assert jnp.allclose(mu, r_mu, atol=5e-2, rtol=5e-2)
    assert jnp.allclose(logvar, r_logvar, atol=5e-2, rtol=5e-2)

    print("KERNEL_OK")
</pallas_src>

<mosaic_0001>
module attributes {stable_mosaic.version = 11 : i64} {
  func.func @_vae_kernel(%arg0: i32, %arg1: memref<8x768xf32, #tpu.memory_space<vmem>>, %arg2: memref<8x128xf32, #tpu.memory_space<vmem>>, %arg3: memref<768x256xbf16, #tpu.memory_space<vmem>>, %arg4: memref<1x256xf32, #tpu.memory_space<vmem>>, %arg5: memref<256x256xbf16, #tpu.memory_space<vmem>>, %arg6: memref<1x256xf32, #tpu.memory_space<vmem>>, %arg7: memref<128x256xbf16, #tpu.memory_space<vmem>>, %arg8: memref<1x256xf32, #tpu.memory_space<vmem>>, %arg9: memref<256x768xbf16, #tpu.memory_space<vmem>>, %arg10: memref<1x768xf32, #tpu.memory_space<vmem>>, %arg11: memref<8x768xf32, #tpu.memory_space<vmem>>, %arg12: memref<8x128xf32, #tpu.memory_space<vmem>>, %arg13: memref<8x128xf32, #tpu.memory_space<vmem>>) attributes {dimension_semantics = [#tpu.dimension_semantics<parallel>], iteration_bounds = array<i64: 1>, scalar_prefetch = 0 : i64, scratch_operands = 0 : i64, tpu.core_type = #tpu.core_type<tc>, window_params = [{transform_indices = @transform_0, window_bounds = array<i64: 8, 768>}, {transform_indices = @transform_1, window_bounds = array<i64: 8, 128>}, {pipeline_mode = #tpu.pipeline_mode<synchronous>, transform_indices = @transform_2, window_bounds = array<i64: 768, 256>}, {pipeline_mode = #tpu.pipeline_mode<synchronous>, transform_indices = @transform_3, window_bounds = array<i64: 1, 256>}, {pipeline_mode = #tpu.pipeline_mode<synchronous>, transform_indices = @transform_4, window_bounds = array<i64: 256, 256>}, {pipeline_mode = #tpu.pipeline_mode<synchronous>, transform_indices = @transform_5, window_bounds = array<i64: 1, 256>}, {pipeline_mode = #tpu.pipeline_mode<synchronous>, transform_indices = @transform_6, window_bounds = array<i64: 128, 256>}, {pipeline_mode = #tpu.pipeline_mode<synchronous>, transform_indices = @transform_7, window_bounds = array<i64: 1, 256>}, {pipeline_mode = #tpu.pipeline_mode<synchronous>, transform_indices = @transform_8, window_bounds = array<i64: 256, 768>}, {pipeline_mode = #tpu.pipeline_mode<synchronous>, transform_indices = @transform_9, window_bounds = array<i64: 1, 768>}, {transform_indices = @transform_10, window_bounds = array<i64: 8, 768>}, {transform_indices = @transform_11, window_bounds = array<i64: 8, 128>}, {transform_indices = @transform_12, window_bounds = array<i64: 8, 128>}]} {
    %c0 = arith.constant 0 : index
    %c0_0 = arith.constant 0 : index
    %0 = vector.load %arg1[%c0, %c0_0] : memref<8x768xf32, #tpu.memory_space<vmem>>, vector<8x768xf32>
    %1 = arith.truncf %0 : vector<8x768xf32> to vector<8x768xbf16>
    %c0_1 = arith.constant 0 : index
    %c0_2 = arith.constant 0 : index
    %2 = vector.load %arg3[%c0_1, %c0_2] : memref<768x256xbf16, #tpu.memory_space<vmem>>, vector<768x256xbf16>
    %cst = arith.constant dense<0.000000e+00> : vector<8x256xf32>
    %3 = tpu.matmul %1, %2, %cst {dimension_numbers = #tpu.dot_dimension_numbers<[1], [0], [0], [1], [0, 0, 1, 1], [], []>} : vector<8x768xbf16>, vector<768x256xbf16>, vector<8x256xf32> -> vector<8x256xf32>
    %c0_3 = arith.constant 0 : index
    %c0_4 = arith.constant 0 : index
    %4 = vector.load %arg4[%c0_3, %c0_4] : memref<1x256xf32, #tpu.memory_space<vmem>>, vector<1x256xf32>
    %5 = vector.broadcast %4 : vector<1x256xf32> to vector<8x256xf32>
    %6 = arith.addf %3, %5 : vector<8x256xf32>
    %cst_5 = arith.constant 0.000000e+00 : f32
    %7 = vector.broadcast %cst_5 : f32 to vector<8x256xf32>
    %8 = arith.maximumf %6, %7 : vector<8x256xf32>
    %9 = arith.truncf %8 : vector<8x256xf32> to vector<8x256xbf16>
    %c0_6 = arith.constant 0 : index
    %c0_7 = arith.constant 0 : index
    %10 = vector.load %arg5[%c0_6, %c0_7] : memref<256x256xbf16, #tpu.memory_space<vmem>>, vector<256x256xbf16>
    %cst_8 = arith.constant dense<0.000000e+00> : vector<8x256xf32>
    %11 = tpu.matmul %9, %10, %cst_8 {dimension_numbers = #tpu.dot_dimension_numbers<[1], [0], [0], [1], [0, 0, 1, 1], [], []>} : vector<8x256xbf16>, vector<256x256xbf16>, vector<8x256xf32> -> vector<8x256xf32>
    %c0_9 = arith.constant 0 : index
    %c0_10 = arith.constant 0 : index
    %12 = vector.load %arg6[%c0_9, %c0_10] : memref<1x256xf32, #tpu.memory_space<vmem>>, vector<1x256xf32>
    %13 = vector.broadcast %12 : vector<1x256xf32> to vector<8x256xf32>
    %14 = arith.addf %11, %13 : vector<8x256xf32>
    %15 = vector.extract_strided_slice %14 {offsets = [0, 0], sizes = [8, 128], strides = [1, 1]} : vector<8x256xf32> to vector<8x128xf32>
    %16 = vector.extract_strided_slice %14 {offsets = [0, 128], sizes = [8, 128], strides = [1, 1]} : vector<8x256xf32> to vector<8x128xf32>
    %cst_11 = arith.constant 5.000000e-01 : f32
    %17 = vector.broadcast %cst_11 : f32 to vector<8x128xf32>
    %18 = arith.mulf %17, %16 : vector<8x128xf32>
    %19 = math.exp %18 : vector<8x128xf32>
    %c0_12 = arith.constant 0 : index
    %c0_13 = arith.constant 0 : index
    %20 = vector.load %arg2[%c0_12, %c0_13] : memref<8x128xf32, #tpu.memory_space<vmem>>, vector<8x128xf32>
    %21 = arith.mulf %20, %19 : vector<8x128xf32>
    %22 = arith.addf %15, %21 : vector<8x128xf32>
    %23 = arith.truncf %22 : vector<8x128xf32> to vector<8x128xbf16>
    %c0_14 = arith.constant 0 : index
    %c0_15 = arith.constant 0 : index
    %24 = vector.load %arg7[%c0_14, %c0_15] : memref<128x256xbf16, #tpu.memory_space<vmem>>, vector<128x256xbf16>
    %cst_16 = arith.constant dense<0.000000e+00> : vector<8x256xf32>
    %25 = tpu.matmul %23, %24, %cst_16 {dimension_numbers = #tpu.dot_dimension_numbers<[1], [0], [0], [1], [0, 0, 1, 1], [], []>} : vector<8x128xbf16>, vector<128x256xbf16>, vector<8x256xf32> -> vector<8x256xf32>
    %c0_17 = arith.constant 0 : index
    %c0_18 = arith.constant 0 : index
    %26 = vector.load %arg8[%c0_17, %c0_18] : memref<1x256xf32, #tpu.memory_space<vmem>>, vector<1x256xf32>
    %27 = vector.broadcast %26 : vector<1x256xf32> to vector<8x256xf32>
    %28 = arith.addf %25, %27 : vector<8x256xf32>
    %cst_19 = arith.constant 0.000000e+00 : f32
    %29 = vector.broadcast %cst_19 : f32 to vector<8x256xf32>
    %30 = arith.maximumf %28, %29 : vector<8x256xf32>
    %31 = arith.truncf %30 : vector<8x256xf32> to vector<8x256xbf16>
    %c0_20 = arith.constant 0 : index
    %c0_21 = arith.constant 0 : index
    %32 = vector.load %arg9[%c0_20, %c0_21] : memref<256x768xbf16, #tpu.memory_space<vmem>>, vector<256x768xbf16>
    %cst_22 = arith.constant dense<0.000000e+00> : vector<8x768xf32>
    %33 = tpu.matmul %31, %32, %cst_22 {dimension_numbers = #tpu.dot_dimension_numbers<[1], [0], [0], [1], [0, 0, 1, 1], [], []>} : vector<8x256xbf16>, vector<256x768xbf16>, vector<8x768xf32> -> vector<8x768xf32>
    %c0_23 = arith.constant 0 : index
    %c0_24 = arith.constant 0 : index
    %34 = vector.load %arg10[%c0_23, %c0_24] : memref<1x768xf32, #tpu.memory_space<vmem>>, vector<1x768xf32>
    %35 = vector.broadcast %34 : vector<1x768xf32> to vector<8x768xf32>
    %36 = arith.addf %33, %35 : vector<8x768xf32>
    %37 = arith.negf %36 : vector<8x768xf32>
    %38 = math.exp %37 : vector<8x768xf32>
    %cst_25 = arith.constant 1.000000e+00 : f32
    %39 = vector.broadcast %cst_25 : f32 to vector<8x768xf32>
    %40 = arith.addf %39, %38 : vector<8x768xf32>
    %41 = arith.divf %39, %40 : vector<8x768xf32>
    %c0_26 = arith.constant 0 : index
    %c0_27 = arith.constant 0 : index
    %42 = vector.load %arg11[%c0_26, %c0_27] : memref<8x768xf32, #tpu.memory_space<vmem>>, vector<8x768xf32>
    tpu.vector_store %arg11[%c0_26, %c0_27], %41 {strides = array<i32>} : memref<8x768xf32, #tpu.memory_space<vmem>>, vector<8x768xf32>,
    %c0_28 = arith.constant 0 : index
    %c0_29 = arith.constant 0 : index
    %43 = vector.load %arg12[%c0_28, %c0_29] : memref<8x128xf32, #tpu.memory_space<vmem>>, vector<8x128xf32>
    tpu.vector_store %arg12[%c0_28, %c0_29], %15 {strides = array<i32>} : memref<8x128xf32, #tpu.memory_space<vmem>>, vector<8x128xf32>,
    %c0_30 = arith.constant 0 : index
    %c0_31 = arith.constant 0 : index
    %44 = vector.load %arg13[%c0_30, %c0_31] : memref<8x128xf32, #tpu.memory_space<vmem>>, vector<8x128xf32>
    tpu.vector_store %arg13[%c0_30, %c0_31], %16 {strides = array<i32>} : memref<8x128xf32, #tpu.memory_space<vmem>>, vector<8x128xf32>,
    return
  }
  func.func @transform_0(%arg0: i32) -> (i32, i32) {
    %c0_i32 = arith.constant 0 : i32
    %c0_i32_0 = arith.constant 0 : i32
    return %arg0, %c0_i32 : i32, i32
  }
  func.func @transform_1(%arg0: i32) -> (i32, i32) {
    %c0_i32 = arith.constant 0 : i32
    %c0_i32_0 = arith.constant 0 : i32
    return %arg0, %c0_i32 : i32, i32
  }
  func.func @transform_2(%arg0: i32) -> (i32, i32) {
    %c0_i32 = arith.constant 0 : i32
    %c0_i32_0 = arith.constant 0 : i32
    %c0_i32_1 = arith.constant 0 : i32
    return %c0_i32, %c0_i32_0 : i32, i32
  }
  func.func @transform_3(%arg0: i32) -> (i32, i32) {
    %c0_i32 = arith.constant 0 : i32
    %c0_i32_0 = arith.constant 0 : i32
    %c0_i32_1 = arith.constant 0 : i32
    return %c0_i32, %c0_i32_0 : i32, i32
  }
  func.func @transform_4(%arg0: i32) -> (i32, i32) {
    %c0_i32 = arith.constant 0 : i32
    %c0_i32_0 = arith.constant 0 : i32
    %c0_i32_1 = arith.constant 0 : i32
    return %c0_i32, %c0_i32_0 : i32, i32
  }
  func.func @transform_5(%arg0: i32) -> (i32, i32) {
    %c0_i32 = arith.constant 0 : i32
    %c0_i32_0 = arith.constant 0 : i32
    %c0_i32_1 = arith.constant 0 : i32
    return %c0_i32, %c0_i32_0 : i32, i32
  }
  func.func @transform_6(%arg0: i32) -> (i32, i32) {
    %c0_i32 = arith.constant 0 : i32
    %c0_i32_0 = arith.constant 0 : i32
    %c0_i32_1 = arith.constant 0 : i32
    return %c0_i32, %c0_i32_0 : i32, i32
  }
  func.func @transform_7(%arg0: i32) -> (i32, i32) {
    %c0_i32 = arith.constant 0 : i32
    %c0_i32_0 = arith.constant 0 : i32
    %c0_i32_1 = arith.constant 0 : i32
    return %c0_i32, %c0_i32_0 : i32, i32
  }
  func.func @transform_8(%arg0: i32) -> (i32, i32) {
    %c0_i32 = arith.constant 0 : i32
    %c0_i32_0 = arith.constant 0 : i32
    %c0_i32_1 = arith.constant 0 : i32
    return %c0_i32, %c0_i32_0 : i32, i32
  }
  func.func @transform_9(%arg0: i32) -> (i32, i32) {
    %c0_i32 = arith.constant 0 : i32
    %c0_i32_0 = arith.constant 0 : i32
    %c0_i32_1 = arith.constant 0 : i32
    return %c0_i32, %c0_i32_0 : i32, i32
  }
  func.func @transform_10(%arg0: i32) -> (i32, i32) {
    %c0_i32 = arith.constant 0 : i32
    %c0_i32_0 = arith.constant 0 : i32
    return %arg0, %c0_i32 : i32, i32
  }
  func.func @transform_11(%arg0: i32) -> (i32, i32) {
    %c0_i32 = arith.constant 0 : i32
    %c0_i32_0 = arith.constant 0 : i32
    return %arg0, %c0_i32 : i32, i32
  }
  func.func @transform_12(%arg0: i32) -> (i32, i32) {
    %c0_i32 = arith.constant 0 : i32
    %c0_i32_0 = arith.constant 0 : i32
    return %arg0, %c0_i32 : i32, i32
  }
}

</mosaic_0001>

<bundles_post_ra>
// kernel: tpu_custom_call.1
= control target key start
LH: loop header
LB: loop body
LE: loop exit
PB: predicated region body
PF: predicated region fallthrough
CT: control target
= control target key end

     0   :  { %18 = vsyncpa [#allocation3], 0  ;;  %s3061_s0 = inlined_call_operand.hbm [shape: f32[8,768], index: 0, kind: input, shape index: {}]   ;;  %s3062_s1 = inlined_call_operand.hbm [shape: f32[8,128], index: 1, kind: input, shape index: {}]   ;;  %s3063_s2 = inlined_call_operand.hbm [shape: bf16[768,256], index: 2, kind: input, shape index: {}]   ;;  %s3064_s3 = inlined_call_operand.vmem [shape: f32[1,256], index: 3, kind: input, shape index: {}]   ;;  %s3065_s4 = inlined_call_operand.hbm [shape: bf16[256,256], index: 4, kind: input, shape index: {}]   ;;  %s3066_s5 = inlined_call_operand.vmem [shape: f32[1,256], index: 5, kind: input, shape index: {}]   ;;  %s3067_s6 = inlined_call_operand.hbm [shape: bf16[128,256], index: 6, kind: input, shape index: {}]   ;;  %s3068_s7 = inlined_call_operand.vmem [shape: f32[1,256], index: 7, kind: input, shape index: {}]   ;;  %s3069_s8 = inlined_call_operand.hbm [shape: bf16[256,768], index: 8, kind: input, shape index: {}]   ;;  %s3070_s9 = inlined_call_operand.vmem [shape: f32[1,768], index: 9, kind: input, shape index: {}]   ;;  %s3071_s10 = inlined_call_operand.hbm [shape: f32[8,768], index: 10, kind: output, shape index: {0}]   ;;  %s3072_s11 = inlined_call_operand.hbm [shape: f32[8,128], index: 11, kind: output, shape index: {1}]   ;;  %s3073_s12 = inlined_call_operand.hbm [shape: f32[8,128], index: 12, kind: output, shape index: {2}]  }
   0x1   :  { %19 = vsyncpa [#allocation6], 0 }
   0x2   :  { %20 = vsyncpa [#allocation9], 0 }
   0x3   :  { %21 = vsyncpa [#allocation12], 0 }
   0x4   :  { %22 = vsyncpa [#allocation4], 0 }
   0x5   :  { %23 = vsyncpa [#allocation15], 0  ;;  %s2909_s21 = smov [#allocation5]  }
   0x6   :  { %s40_s22 = sshll.u32 %s2909_s21, 4  ;;  %s41_s22 = int_to_ptr.vmem [resolvable:$true] %s40_s22 }
   0x7   :  { %s2725_s23 = scalar_lea.vmem %s41_s22, 128  ;;  %p2730_p1 = scmp.lt.s32.totalorder %s41_s22, %s41_s22 }
   0x8   :  { %p2726_p0 = scmp.ne.s32.totalorder %s41_s22, %s2725_s23  ;;  %p2731_p2 = scmp.lt.s32.totalorder %s2725_s23, %s2725_s23 }
   0xa   :  { %p2732_p3 = por %p2731_p2, %p2730_p1 }
   0xc   :  { %p2733_p4 = pnand %p2732_p3, %p2726_p0 }
   0xe   :  { %2736 = shalt.err (!%p2733_p4)
}
   0xf   :  { %43 = dma.hbm_to_vmem [thread:$0]  %s3062_s1, 128, %s41_s22, [#allocation6]  }
  0x10   :  { %s2910_s26 = smov [#allocation8]   ;;  %s2911_s28 = smov [#allocation2]  }
  0x11   :  { %s63_s27 = sshll.u32 %s2910_s26, 4  ;;  %s30_s29 = sshll.u32 %s2911_s28, 4  ;;  %s64_s27 = int_to_ptr.vmem [resolvable:$true] %s63_s27  ;;  %s31_s29 = int_to_ptr.vmem [resolvable:$true] %s30_s29 }
  0x12   :  { %s2745_s30 = scalar_lea.vmem %s64_s27, 4096  ;;  %p2750_p6 = scmp.lt.s32.totalorder %s64_s27, %s64_s27 }
  0x13   :  { %p2746_p5 = scmp.ne.s32.totalorder %s64_s27, %s2745_s30  ;;  %p2751_p7 = scmp.lt.s32.totalorder %s2745_s30, %s2745_s30 }
  0x15   :  { %p2752_p8 = por %p2751_p7, %p2750_p6 }
  0x17   :  { %p2753_p9 = pnand %p2752_p8, %p2746_p5 }
  0x19   :  { %2756 = shalt.err (!%p2753_p9)
}
  0x1a   :  { %s2912_s13 = smov 128   ;;  %s2913_s14 = smov 8  }
  0x1b   :  { %69 = dma.hbm_to_vmem [thread:$0]  %s3065_s4, 4096, %s64_s27, [#allocation9], %s2912_s13, %s2912_s13, %s2913_s14  }
  0x1c   :  { %s2765_s1 = scalar_lea.vmem %s31_s29, 768  ;;  %p2770_p11 = scmp.lt.s32.totalorder %s31_s29, %s31_s29 }
  0x1d   :  { %p2766_p10 = scmp.ne.s32.totalorder %s31_s29, %s2765_s1  ;;  %p2771_p12 = scmp.lt.s32.totalorder %s2765_s1, %s2765_s1 }
  0x1f   :  { %p2772_p13 = por %p2771_p12, %p2770_p11 }
  0x21   :  { %p2773_p0 = pnand %p2772_p13, %p2766_p10 }
  0x23   :  { %2776 = shalt.err (!%p2773_p0)
}
  0x24   :  { %33 = dma.hbm_to_vmem [thread:$0]  %s3061_s0, 768, %s31_s29, [#allocation3]  }
  0x25   :  { %s2914_s19 = smov [#allocation7]   ;;  %s2915_s21 = smov [#allocation10]  }
  0x26   :  { %s49_s20 = sshll.u32 %s2914_s19, 4  ;;  %s77_s22 = sshll.u32 %s2915_s21, 4  ;;  %s50_s20 = int_to_ptr.vmem [resolvable:$true] %s49_s20  ;;  %s78_s22 = int_to_ptr.vmem [resolvable:$true] %s77_s22 }
  0x27   :  { %s2785_s23 = scalar_lea.vmem %s50_s20, 12288  ;;  %p2790_p2 = scmp.lt.s32.totalorder %s50_s20, %s50_s20 }
  0x28   :  { %p2786_p1 = scmp.ne.s32.totalorder %s50_s20, %s2785_s23  ;;  %p2791_p3 = scmp.lt.s32.totalorder %s2785_s23, %s2785_s23 }
  0x2a   :  { %p2792_p4 = por %p2791_p3, %p2790_p2 }
  0x2c   :  { %p2793_p5 = pnand %p2792_p4, %p2786_p1 }
  0x2e   :  { %2796 = shalt.err (!%p2793_p5)
}
  0x2f   :  { %55 = dma.hbm_to_vmem [thread:$0]  %s3063_s2, 12288, %s50_s20, [#allocation6], %s2912_s13, %s2912_s13, %s2913_s14  }
  0x30   :  { %s2805_s0 = scalar_lea.vmem %s78_s22, 2048  ;;  %p2810_p7 = scmp.lt.s32.totalorder %s78_s22, %s78_s22 }
  0x31   :  { %p2806_p6 = scmp.ne.s32.totalorder %s78_s22, %s2805_s0  ;;  %p2811_p8 = scmp.lt.s32.totalorder %s2805_s0, %s2805_s0 }
  0x33   :  { %p2812_p9 = por %p2811_p8, %p2810_p7 }
  0x35   :  { %p2813_p10 = pnand %p2812_p9, %p2806_p6 }
  0x37   :  { %2816 = shalt.err (!%p2813_p10)
}
  0x38   :  { %83 = dma.hbm_to_vmem [thread:$0]  %s3067_s6, 2048, %s78_s22, [#allocation9], %s2912_s13, %s2912_s13, %s2913_s14  }
  0x39   :  { %s2916_s27 = smov [#allocation11]  }
  0x3a   :  { %s91_s28 = sshll.u32 %s2916_s27, 4  ;;  %s92_s28 = int_to_ptr.vmem [resolvable:$true] %s91_s28 }
  0x3b   :  { %s2825_s29 = scalar_lea.vmem %s92_s28, 12288  ;;  %p2830_p12 = scmp.lt.s32.totalorder %s92_s28, %s92_s28 }
  0x3c   :  { %p2826_p11 = scmp.ne.s32.totalorder %s92_s28, %s2825_s29  ;;  %p2831_p13 = scmp.lt.s32.totalorder %s2825_s29, %s2825_s29 }
  0x3e   :  { %p2832_p0 = por %p2831_p13, %p2830_p12 }
  0x40   :  { %p2833_p1 = pnand %p2832_p0, %p2826_p11 }
  0x42   :  { %2836 = shalt.err (!%p2833_p1)
}
  0x43   :  { %s2917_s2 = smov 384   ;;  %s2918_s30 = smov 24  }
  0x44   :  { %97 = dma.hbm_to_vmem [thread:$0]  %s3069_s8, 12288, %s92_s28, [#allocation12], %s2917_s2, %s2917_s2, %s2918_s30  }
  0x45   :  { %2897 = dma.done.wait [#allocation3], 768  }
  0x46   :  { %2898 = vsyncadd [#allocation3], 4294966528 }
  0x47   :  { %2899 = dma.done.wait [#allocation6], 12416  }
  0x48   :  { %2900 = vsyncadd [#allocation6], 4294954880 }
  0x49   :  { %2901 = dma.done.wait [#allocation9], 6144  }
  0x4a   :  { %2902 = vsyncadd [#allocation9], 4294961152 }
  0x4b   :  { %2903 = dma.done.wait [#allocation12], 12288  }
  0x4c   :  { %2904 = vsyncadd [#allocation12], 4294955008  ;;  %v2331_v0 = vld [vmem:[#allocation7 + $0x74] ss:$8 sps:$4 sm:$0xff]   ;;  %v2333_v1 = vld [vmem:[#allocation7 + $0x70] ss:$8 sps:$4 sm:$0xff]  }
  0x4d   :  { %719 = vmatprep.subr.bf16.mxu0 %v2331_v0  ;;  %v2334_v2 = vld [vmem:[#allocation7 + $0x174] ss:$8 sps:$4 sm:$0xff]   ;;  %v2336_v3 = vld [vmem:[#allocation7 + $0x170] ss:$8 sps:$4 sm:$0xff]   ;;  %v2337_v4 = vld [vmem:[#allocation7 + $0x64] ss:$8 sps:$4 sm:$0xff]  }
  0x4e   :  { %720 = vmatpush1.bf16.msra.mxu0 %v2333_v1  ;;  %v2339_v5 = vld [vmem:[#allocation7 + $0x60] ss:$8 sps:$4 sm:$0xff]   ;;  %760 = vmatprep.subr.bf16.mxu1 %v2334_v2  ;;  %v2340_v6 = vld [vmem:[#allocation7 + $0x164] ss:$8 sps:$4 sm:$0xff]   ;;  %v2343_v8 = vld [vmem:[#allocation7 + $0x54] ss:$8 sps:$4 sm:$0xff]  }
  0x4f   :  { %761 = vmatpush1.bf16.msra.mxu1 %v2336_v3  ;;  %721 = vmatprep.subr.bf16.mxu0 %v2337_v4  ;;  %v2342_v7 = vld [vmem:[#allocation7 + $0x160] ss:$8 sps:$4 sm:$0xff]   ;;  %v2345_v9 = vld [vmem:[#allocation7 + $0x50] ss:$8 sps:$4 sm:$0xff]   ;;  %v2346_v10 = vld [vmem:[#allocation7 + $0x154] ss:$8 sps:$4 sm:$0xff]  }
  0x50   :  { %762 = vmatprep.subr.bf16.mxu1 %v2340_v6  ;;  %v2349_v11 = vld [vmem:[#allocation7 + $0x44] ss:$8 sps:$4 sm:$0xff]   ;;  %v2348_v12 = vld [vmem:[#allocation7 + $0x150] ss:$8 sps:$4 sm:$0xff]   ;;  %v2351_v14 = vld [vmem:[#allocation7 + $0x40] ss:$8 sps:$4 sm:$0xff]  }
  0x51   :  { %v2352_v13 = vld [vmem:[#allocation7 + $0x144] ss:$8 sps:$4 sm:$0xff]   ;;  %v2355_v15 = vld [vmem:[#allocation7 + $0x34] ss:$8 sps:$4 sm:$0xff]   ;;  %v2354_v16 = vld [vmem:[#allocation7 + $0x140] ss:$8 sps:$4 sm:$0xff]  }
  0x52   :  { %722 = vmatpush1.bf16.msra.mxu0 %v2339_v5  ;;  %v2358_v17 = vld [vmem:[#allocation7 + $0x134] ss:$8 sps:$4 sm:$0xff]   ;;  %v2357_v18 = vld [vmem:[#allocation7 + $0x30] ss:$8 sps:$4 sm:$0xff]   ;;  %v2361_v19 = vld [vmem:[#allocation7 + $0x24] ss:$8 sps:$4 sm:$0xff]  }
  0x53   :  { %723 = vmatprep.subr.bf16.mxu0 %v2343_v8  ;;  %763 = vmatpush1.bf16.msra.mxu1 %v2342_v7  ;;  %v2360_v20 = vld [vmem:[#allocation7 + $0x130] ss:$8 sps:$4 sm:$0xff]   ;;  %v2364_v21 = vld [vmem:[#allocation7 + $0x124] ss:$8 sps:$4 sm:$0xff]   ;;  %v2363_v22 = vld [vmem:[#allocation7 + $0x20] ss:$8 sps:$4 sm:$0xff]  }
  0x54   :  { %764 = vmatprep.subr.bf16.mxu1 %v2346_v10  ;;  %v2367_v23 = vld [vmem:[#allocation7 + $0x14] ss:$8 sps:$4 sm:$0xff]   ;;  %v2366_v24 = vld [vmem:[#allocation7 + $0x120] ss:$8 sps:$4 sm:$0xff]   ;;  %v2369_v26 = vld [vmem:[#allocation7 + $0x10] ss:$8 sps:$4 sm:$0xff]  }
  0x55   :  { %v2370_v25 = vld [vmem:[#allocation7 + $0x114] ss:$8 sps:$4 sm:$0xff]   ;;  %v2373_v27 = vld [vmem:[#allocation7 + $0x4] ss:$8 sps:$4 sm:$0xff]   ;;  %v2372_v28 = vld [vmem:[#allocation7 + $0x110] ss:$8 sps:$4 sm:$0xff]  }
  0x56   :  { %724 = vmatpush1.bf16.msra.mxu0 %v2345_v9  ;;  %v2376_v29 = vld [vmem:[#allocation7 + $0x104] ss:$8 sps:$4 sm:$0xff]   ;;  %v2375_v30 = vld [vmem:[#allocation7] ss:$8 sps:$4 sm:$0xff]   ;;  %v2379_v31 = vld [vmem:[#allocation7 + $0xf4] ss:$8 sps:$4 sm:$0xff]  }
  0x57   :  { %725 = vmatprep.subr.bf16.mxu0 %v2349_v11  ;;  %765 = vmatpush1.bf16.msra.mxu1 %v2348_v12  ;;  %v2378_v32 = vld [vmem:[#allocation7 + $0x100] ss:$8 sps:$4 sm:$0xff]   ;;  %v2382_v33 = vld [vmem:[#allocation7 + $0x1f4] ss:$8 sps:$4 sm:$0xff]   ;;  %v2381_v34 = vld [vmem:[#allocation7 + $0xf0] ss:$8 sps:$4 sm:$0xff]  }
  0x58   :  { %766 = vmatprep.subr.bf16.mxu1 %v2352_v13  ;;  %v2385_v35 = vld [vmem:[#allocation7 + $0xe4] ss:$8 sps:$4 sm:$0xff]   ;;  %v2384_v36 = vld [vmem:[#allocation7 + $0x1f0] ss:$8 sps:$4 sm:$0xff]   ;;  %v2387_v38 = vld [vmem:[#allocation7 + $0xe0] ss:$8 sps:$4 sm:$0xff]  }
  0x59   :  { %v2388_v37 = vld [vmem:[#allocation7 + $0x1e4] ss:$8 sps:$4 sm:$0xff]   ;;  %v2391_v39 = vld [vmem:[#allocation7 + $0xd4] ss:$8 sps:$4 sm:$0xff]   ;;  %v2390_v40 = vld [vmem:[#allocation7 + $0x1e0] ss:$8 sps:$4 sm:$0xff]  }
  0x5a   :  { %726 = vmatpush1.bf16.msra.mxu0 %v2351_v14  ;;  %v2394_v41 = vld [vmem:[#allocation7 + $0x1d4] ss:$8 sps:$4 sm:$0xff]   ;;  %v2393_v42 = vld [vmem:[#allocation7 + $0xd0] ss:$8 sps:$4 sm:$0xff]   ;;  %v2397_v43 = vld [vmem:[#allocation7 + $0xc4] ss:$8 sps:$4 sm:$0xff]  }
  0x5b   :  { %727 = vmatprep.subr.bf16.mxu0 %v2355_v15  ;;  %767 = vmatpush1.bf16.msra.mxu1 %v2354_v16  ;;  %v2396_v44 = vld [vmem:[#allocation7 + $0x1d0] ss:$8 sps:$4 sm:$0xff]   ;;  %v2400_v45 = vld [vmem:[#allocation7 + $0x1c4] ss:$8 sps:$4 sm:$0xff]   ;;  %v2399_v47 = vld [vmem:[#allocation7 + $0xc0] ss:$8 sps:$4 sm:$0xff]  }
  0x5c   :  { %768 = vmatprep.subr.bf16.mxu1 %v2358_v17  ;;  %v120_v46 = vld [vmem:[#allocation2 + $0x8] sm:$0xff]  ;;  %v122_v50 = vld [vmem:[#allocation2 + $0x18] sm:$0xff]  ;;  %v119_v4 = vld [vmem:[#allocation2] sm:$0xff] }
  0x5d   :  { %v126_v48 = vpack.c.bf16 %v120_v46, %v120_v46  ;;  %v2403_v49 = vld [vmem:[#allocation7 + $0xb4] ss:$8 sps:$4 sm:$0xff]   ;;  %v2402_v51 = vld [vmem:[#allocation7 + $0x1c0] ss:$8 sps:$4 sm:$0xff]   ;;  %v128_v52 = vpack.c.bf16 %v122_v50, %v122_v50  ;;  %v2405_v54 = vld [vmem:[#allocation7 + $0xb0] ss:$8 sps:$4 sm:$0xff]   ;;  %v125_v7 = vpack.c.bf16 %v119_v4, %v119_v4 }
  0x5e   :  { %728 = vmatpush1.bf16.msra.mxu0 %v2357_v18  ;;  %v2406_v53 = vld [vmem:[#allocation7 + $0x1b4] ss:$8 sps:$4 sm:$0xff]   ;;  %v2409_v55 = vld [vmem:[#allocation7 + $0xa4] ss:$8 sps:$4 sm:$0xff]   ;;  %v2408_v56 = vld [vmem:[#allocation7 + $0x1b0] ss:$8 sps:$4 sm:$0xff]  }
  0x5f   :  { %729 = vmatprep.subr.bf16.mxu0 %v2361_v19  ;;  %769 = vmatpush1.bf16.msra.mxu1 %v2360_v20  ;;  %v2412_v57 = vld [vmem:[#allocation7 + $0x1a4] ss:$8 sps:$4 sm:$0xff]   ;;  %v2411_v58 = vld [vmem:[#allocation7 + $0xa0] ss:$8 sps:$4 sm:$0xff]   ;;  %v2415_v59 = vld [vmem:[#allocation7 + $0x94] ss:$8 sps:$4 sm:$0xff]  }
  0x60   :  { %770 = vmatprep.subr.bf16.mxu1 %v2364_v21  ;;  %751 = vmatprep.mubr.bf16.mxu0 %v126_v48  ;;  %v2414_v60 = vld [vmem:[#allocation7 + $0x1a0] ss:$8 sps:$4 sm:$0xff]   ;;  %v2418_v61 = vld [vmem:[#allocation7 + $0x194] ss:$8 sps:$4 sm:$0xff]   ;;  %v2417_v62 = vld [vmem:[#allocation7 + $0x90] ss:$8 sps:$4 sm:$0xff]  }
  0x61   :  { %792 = vmatprep.mubr.bf16.mxu1 %v128_v52  ;;  %v2421_v63 = vld [vmem:[#allocation7 + $0x84] ss:$8 sps:$4 sm:$0xff]   ;;  %v2420_v0 = vld [vmem:[#allocation7 + $0x190] ss:$8 sps:$4 sm:$0xff]   ;;  %v2423_v1 = vld [vmem:[#allocation7 + $0x80] ss:$8 sps:$4 sm:$0xff]  }
  0x62   :  { %730 = vmatpush1.bf16.msra.mxu0 %v2363_v22  ;;  %v2424_v2 = vld [vmem:[#allocation7 + $0x184] ss:$8 sps:$4 sm:$0xff]   ;;  %v2426_v3 = vld [vmem:[#allocation7 + $0x180] ss:$8 sps:$4 sm:$0xff]   ;;  %v2429_v5 = vld [vmem:[#allocation7 + $0x274] ss:$8 sps:$4 sm:$0xff]  }
  0x63   :  { %731 = vmatprep.subr.bf16.mxu0 %v2367_v23  ;;  %771 = vmatpush1.bf16.msra.mxu1 %v2366_v24  ;;  %v121_v6 = vld [vmem:[#allocation2 + $0x10] sm:$0xff]  ;;  %v2432_v10 = vld [vmem:[#allocation7 + $0x264] ss:$8 sps:$4 sm:$0xff]   ;;  %v2430_v11 = vld [vmem:[#allocation7 + $0x260] ss:$8 sps:$4 sm:$0xff]  }
  0x64   :  { %772 = vmatprep.subr.bf16.mxu1 %v2370_v25  ;;  %v2427_v8 = vld [vmem:[#allocation7 + $0x270] ss:$8 sps:$4 sm:$0xff]   ;;  %v127_v9 = vpack.c.bf16 %v121_v6, %v121_v6  ;;  %v2435_v13 = vld [vmem:[#allocation7 + $0x254] ss:$8 sps:$4 sm:$0xff]   ;;  %v2438_v16 = vld [vmem:[#allocation7 + $0x244] ss:$8 sps:$4 sm:$0xff]  }
  0x65   :  { %v124_v12 = vld [vmem:[#allocation2 + $0x28] sm:$0xff]  ;;  %v2436_v17 = vld [vmem:[#allocation7 + $0x240] ss:$8 sps:$4 sm:$0xff]   ;;  %v2444_v20 = vld [vmem:[#allocation7 + $0x224] ss:$8 sps:$4 sm:$0xff]  }
  0x66   :  { %732 = vmatpush1.bf16.msra.mxu0 %v2369_v26  ;;  %v130_v14 = vpack.c.bf16 %v124_v12, %v124_v12  ;;  %v2433_v15 = vld [vmem:[#allocation7 + $0x250] ss:$8 sps:$4 sm:$0xff]   ;;  %v2441_v18 = vld [vmem:[#allocation7 + $0x234] ss:$8 sps:$4 sm:$0xff]   ;;  %v2442_v21 = vld [vmem:[#allocation7 + $0x220] ss:$8 sps:$4 sm:$0xff]  }
  0x67   :  { %733 = vmatprep.subr.bf16.mxu0 %v2373_v27  ;;  %773 = vmatpush1.bf16.msra.mxu1 %v2372_v28  ;;  %v2439_v19 = vld [vmem:[#allocation7 + $0x230] ss:$8 sps:$4 sm:$0xff]   ;;  %v2447_v22 = vld [vmem:[#allocation7 + $0x214] ss:$8 sps:$4 sm:$0xff]   ;;  %v2450_v24 = vld [vmem:[#allocation7 + $0x204] ss:$8 sps:$4 sm:$0xff]  }
  0x68   :  { %774 = vmatprep.subr.bf16.mxu1 %v2376_v29  ;;  %v2445_v23 = vld [vmem:[#allocation7 + $0x210] ss:$8 sps:$4 sm:$0xff]   ;;  %v2448_v25 = vld [vmem:[#allocation7 + $0x200] ss:$8 sps:$4 sm:$0xff]   ;;  %v2453_v26 = vld [vmem:[#allocation7 + $0x2f4] ss:$8 sps:$4 sm:$0xff]  }
  0x69   :  { %v2451_v27 = vld [vmem:[#allocation7 + $0x2f0] ss:$8 sps:$4 sm:$0xff]   ;;  %v2456_v28 = vld [vmem:[#allocation7 + $0x2e4] ss:$8 sps:$4 sm:$0xff]   ;;  %v2454_v29 = vld [vmem:[#allocation7 + $0x2e0] ss:$8 sps:$4 sm:$0xff]  }
  0x6a   :  { %734 = vmatpush1.bf16.msra.mxu0 %v2375_v30  ;;  %v2459_v30 = vld [vmem:[#allocation7 + $0x2d4] ss:$8 sps:$4 sm:$0xff]   ;;  %v2480_v46 = vld [vmem:[#allocation8 + $0x64] ss:$8 sps:$4 sm:$0xff]   ;;  %v2523_v12 = vld [vmem:[#allocation10 + $0x70] ss:$8 sps:$4 sm:$0xff]  }
  0x6b   :  { %735 = vmatprep.subr.bf16.mxu0 %v2379_v31  ;;  %775 = vmatpush1.bf16.msra.mxu1 %v2378_v32  ;;  %v2457_v31 = vld [vmem:[#allocation7 + $0x2d0] ss:$8 sps:$4 sm:$0xff]   ;;  %v2462_v32 = vld [vmem:[#allocation7 + $0x2c4] ss:$8 sps:$4 sm:$0xff]   ;;  %v2483_v48 = vld [vmem:[#allocation8 + $0x54] ss:$8 sps:$4 sm:$0xff]  }
  0x6c   :  { %776 = vmatprep.subr.bf16.mxu1 %v2382_v33  ;;  %v2460_v33 = vld [vmem:[#allocation7 + $0x2c0] ss:$8 sps:$4 sm:$0xff]   ;;  %v2486_v50 = vld [vmem:[#allocation8 + $0x44] ss:$8 sps:$4 sm:$0xff]   ;;  %v2489_v52 = vld [vmem:[#allocation8 + $0x34] ss:$8 sps:$4 sm:$0xff]  }
  0x6d   :  { %v2513_v4 = vld [vmem:[#allocation8 + $0xb4] ss:$8 sps:$4 sm:$0xff]   ;;  %v2516_v6 = vld [vmem:[#allocation8 + $0xa4] ss:$8 sps:$4 sm:$0xff]  }
  0x6e   :  { %736 = vmatpush2.bf16.msra.mxu0 %v2381_v34  ;;  %v2465_v34 = vld [vmem:[#allocation7 + $0x2b4] ss:$8 sps:$4 sm:$0xff]  }
  0x6f   :  { %737 = vmatprep.subr.bf16.mxu0 %v2385_v35  ;;  %777 = vmatpush2.bf16.msra.mxu1 %v2384_v36  ;;  %v2463_v35 = vld [vmem:[#allocation7 + $0x2b0] ss:$8 sps:$4 sm:$0xff]   ;;  %v2468_v36 = vld [vmem:[#allocation7 + $0x2a4] ss:$8 sps:$4 sm:$0xff]  }
  0x70   :  { %778 = vmatprep.subr.bf16.mxu1 %v2388_v37  ;;  %v2466_v37 = vld [vmem:[#allocation7 + $0x2a0] ss:$8 sps:$4 sm:$0xff]  }
  0x72   :  { %738 = vmatpush2.bf16.msra.mxu0 %v2387_v38  ;;  %v2471_v38 = vld [vmem:[#allocation7 + $0x294] ss:$8 sps:$4 sm:$0xff]  }
  0x73   :  { %739 = vmatprep.subr.bf16.mxu0 %v2391_v39  ;;  %779 = vmatpush2.bf16.msra.mxu1 %v2390_v40  ;;  %v2469_v39 = vld [vmem:[#allocation7 + $0x290] ss:$8 sps:$4 sm:$0xff]   ;;  %v2474_v40 = vld [vmem:[#allocation7 + $0x284] ss:$8 sps:$4 sm:$0xff]  }
  0x74   :  { %780 = vmatprep.subr.bf16.mxu1 %v2394_v41  ;;  %v2472_v41 = vld [vmem:[#allocation7 + $0x280] ss:$8 sps:$4 sm:$0xff]  }
  0x76   :  { %740 = vmatpush2.bf16.msra.mxu0 %v2393_v42  ;;  %v123_v42 = vld [vmem:[#allocation2 + $0x20] sm:$0xff] }
  0x77   :  { %741 = vmatprep.subr.bf16.mxu0 %v2397_v43  ;;  %781 = vmatpush2.bf16.msra.mxu1 %v2396_v44  ;;  %v129_v43 = vpack.c.bf16 %v123_v42, %v123_v42  ;;  %v2475_v44 = vld [vmem:[#allocation8 + $0x70] ss:$8 sps:$4 sm:$0xff]  }
  0x78   :  { %782 = vmatprep.subr.bf16.mxu1 %v2400_v45  ;;  %v2477_v45 = vld [vmem:[#allocation8 + $0x74] ss:$8 sps:$4 sm:$0xff]  }
  0x7a   :  { %742 = vmatpush2.bf16.msra.mxu0 %v2399_v47  ;;  %v2478_v47 = vld [vmem:[#allocation8 + $0x60] ss:$8 sps:$4 sm:$0xff]  }
  0x7b   :  { %743 = vmatprep.subr.bf16.mxu0 %v2403_v49  ;;  %783 = vmatpush2.bf16.msra.mxu1 %v2402_v51  ;;  %v2481_v49 = vld [vmem:[#allocation8 + $0x50] ss:$8 sps:$4 sm:$0xff]   ;;  %v2484_v51 = vld [vmem:[#allocation8 + $0x40] ss:$8 sps:$4 sm:$0xff]  }
  0x7c   :  { %784 = vmatprep.subr.bf16.mxu1 %v2406_v53  ;;  %v2487_v53 = vld [vmem:[#allocation8 + $0x30] ss:$8 sps:$4 sm:$0xff]  }
  0x7e   :  { %744 = vmatpush2.bf16.msra.mxu0 %v2405_v54  ;;  %v2492_v54 = vld [vmem:[#allocation8 + $0x24] ss:$8 sps:$4 sm:$0xff]  }
  0x7f   :  { %745 = vmatprep.subr.bf16.mxu0 %v2409_v55  ;;  %785 = vmatpush2.bf16.msra.mxu1 %v2408_v56  ;;  %v2490_v55 = vld [vmem:[#allocation8 + $0x20] ss:$8 sps:$4 sm:$0xff]   ;;  %v2495_v56 = vld [vmem:[#allocation8 + $0x14] ss:$8 sps:$4 sm:$0xff]  }
  0x80   :  { %786 = vmatprep.subr.bf16.mxu1 %v2412_v57  ;;  %v2493_v57 = vld [vmem:[#allocation8 + $0x10] ss:$8 sps:$4 sm:$0xff]  }
  0x82   :  { %746 = vmatpush2.bf16.msra.mxu0 %v2411_v58  ;;  %v2498_v58 = vld [vmem:[#allocation8 + $0x4] ss:$8 sps:$4 sm:$0xff]  }
  0x83   :  { %747 = vmatprep.subr.bf16.mxu0 %v2415_v59  ;;  %787 = vmatpush2.bf16.msra.mxu1 %v2414_v60  ;;  %v2496_v59 = vld [vmem:[#allocation8] ss:$8 sps:$4 sm:$0xff]   ;;  %v2501_v60 = vld [vmem:[#allocation8 + $0xf4] ss:$8 sps:$4 sm:$0xff]  }
  0x84   :  { %788 = vmatprep.subr.bf16.mxu1 %v2418_v61  ;;  %v2499_v61 = vld [vmem:[#allocation8 + $0xf0] ss:$8 sps:$4 sm:$0xff]  }
  0x86   :  { %748 = vmatpush2.bf16.msra.mxu0 %v2417_v62  ;;  %v2504_v62 = vld [vmem:[#allocation8 + $0xe4] ss:$8 sps:$4 sm:$0xff]  }
  0x87   :  { %749 = vmatprep.subr.bf16.mxu0 %v2421_v63  ;;  %789 = vmatpush2.bf16.msra.mxu1 %v2420_v0  ;;  %v2502_v63 = vld [vmem:[#allocation8 + $0xe0] ss:$8 sps:$4 sm:$0xff]   ;;  %v2507_v0 = vld [vmem:[#allocation8 + $0xd4] ss:$8 sps:$4 sm:$0xff]  }
  0x88   :  { %790 = vmatprep.subr.bf16.mxu1 %v2424_v2  ;;  %v2510_v2 = vld [vmem:[#allocation8 + $0xc4] ss:$8 sps:$4 sm:$0xff]  }
  0x8a   :  { %750 = vmatpush2.bf16.msra.mxu0 %v2423_v1  ;;  %v2505_v1 = vld [vmem:[#allocation8 + $0xd0] ss:$8 sps:$4 sm:$0xff]  }
  0x8b   :  { %801 = vmatprep.subr.bf16.mxu0 %v2429_v5  ;;  %791 = vmatpush2.bf16.msra.mxu1 %v2426_v3  ;;  %v2508_v3 = vld [vmem:[#allocation8 + $0xc0] ss:$8 sps:$4 sm:$0xff]   ;;  %v2511_v5 = vld [vmem:[#allocation8 + $0xb0] ss:$8 sps:$4 sm:$0xff]  }
  0x8c   :  { %1050 = vmatprep.subr.bf16.mxu1 %v2477_v45  ;;  %v2531_v45 = vld [vmem:[#allocation10 + $0x54] ss:$8 sps:$4 sm:$0xff]  }
  0x8d   :  { %752 = vmatmul.mubr.bf16.vlgmr.msra.gmra.mxu0 %v125_v7  ;;  %v2514_v7 = vld [vmem:[#allocation8 + $0xa0] ss:$8 sps:$4 sm:$0xff]  }
  0x8e   :  { %802 = vmatpush1.bf16.msra.mxu0 %v2427_v8  ;;  %793 = vmatmul.mubr.bf16.vlgmr.msra.gmra.mxu1 %v127_v9  ;;  %v2519_v8 = vld [vmem:[#allocation8 + $0x94] ss:$8 sps:$4 sm:$0xff]   ;;  %v2517_v9 = vld [vmem:[#allocation8 + $0x90] ss:$8 sps:$4 sm:$0xff]  }
  0x8f   :  { %803 = vmatprep.subr.bf16.mxu0 %v2432_v10  ;;  %833 = vmatprep.mubr.bf16.mxu0 %v130_v14  ;;  %v2522_v10 = vld [vmem:[#allocation8 + $0x84] ss:$8 sps:$4 sm:$0xff]  }
  0x90   :  { %1051 = vmatpush1.bf16.msra.mxu1 %v2475_v44  ;;  %v2526_v44 = vld [vmem:[#allocation10 + $0x60] ss:$8 sps:$4 sm:$0xff]  }
  0x91   :  { %1052 = vmatprep.subr.bf16.mxu1 %v2480_v46  ;;  %v2529_v46 = vld [vmem:[#allocation10 + $0x50] ss:$8 sps:$4 sm:$0xff]  }
  0x92   :  { %804 = vmatpush1.bf16.msra.mxu0 %v2430_v11  ;;  %v2520_v11 = vld [vmem:[#allocation8 + $0x80] ss:$8 sps:$4 sm:$0xff]  }
  0x93   :  { %805 = vmatprep.subr.bf16.mxu0 %v2435_v13  ;;  %v2525_v13 = vld [vmem:[#allocation10 + $0x74] ss:$8 sps:$4 sm:$0xff]  }
  0x94   :  { %1053 = vmatpush1.bf16.msra.mxu1 %v2478_v47  ;;  %v2534_v47 = vld [vmem:[#allocation10 + $0x44] ss:$8 sps:$4 sm:$0xff]  }
  0x95   :  { %1054 = vmatprep.subr.bf16.mxu1 %v2483_v48  ;;  %v2532_v48 = vld [vmem:[#allocation10 + $0x40] ss:$8 sps:$4 sm:$0xff]  }
  0x96   :  { %806 = vmatpush1.bf16.msra.mxu0 %v2433_v15 }
  0x97   :  { %807 = vmatprep.subr.bf16.mxu0 %v2438_v16 }
  0x98   :  { %1055 = vmatpush1.bf16.msra.mxu1 %v2481_v49  ;;  %v2537_v49 = vld [vmem:[#allocation10 + $0x34] ss:$8 sps:$4 sm:$0xff]  }
  0x99   :  { %1056 = vmatprep.subr.bf16.mxu1 %v2486_v50  ;;  %v2535_v50 = vld [vmem:[#allocation10 + $0x30] ss:$8 sps:$4 sm:$0xff]  }
  0x9a   :  { %808 = vmatpush1.bf16.msra.mxu0 %v2436_v17 }
  0x9b   :  { %809 = vmatprep.subr.bf16.mxu0 %v2441_v18 }
  0x9c   :  { %1057 = vmatpush1.bf16.msra.mxu1 %v2484_v51  ;;  %v2540_v51 = vld [vmem:[#allocation10 + $0x24] ss:$8 sps:$4 sm:$0xff]  }
  0x9d   :  { %1058 = vmatprep.subr.bf16.mxu1 %v2489_v52  ;;  %v2919_v52 = vmov 0  }
  0x9e   :  { %810 = vmatpush1.bf16.msra.mxu0 %v2439_v19 }
  0x9f   :  { %811 = vmatprep.subr.bf16.mxu0 %v2444_v20 }
  0xa0   :  { %1059 = vmatpush1.bf16.msra.mxu1 %v2487_v53  ;;  %v2538_v53 = vld [vmem:[#allocation10 + $0x20] ss:$8 sps:$4 sm:$0xff]  }
  0xa1   :  { %1060 = vmatprep.subr.bf16.mxu1 %v2492_v54  ;;  %v2543_v54 = vld [vmem:[#allocation10 + $0x14] ss:$8 sps:$4 sm:$0xff]  }
  0xa2   :  { %812 = vmatpush1.bf16.msra.mxu0 %v2442_v21 }
  0xa3   :  { %813 = vmatprep.subr.bf16.mxu0 %v2447_v22  ;;  %v229_v22 = vlaneseq }
  0xa4   :  { %1061 = vmatpush1.bf16.msra.mxu1 %v2490_v55  ;;  %v2541_v55 = vld [vmem:[#allocation10 + $0x10] ss:$8 sps:$4 sm:$0xff]  }
  0xa5   :  { %1062 = vmatprep.subr.bf16.mxu1 %v2495_v56  ;;  %v2546_v56 = vld [vmem:[#allocation10 + $0x4] ss:$8 sps:$4 sm:$0xff]  }
  0xa6   :  { %814 = vmatpush1.bf16.msra.mxu0 %v2445_v23  ;;  %v3015_v23 = vshrl.u32 %v229_v22, 7  ;;  %v2625_v22 = vld [vmem:[#allocation11 + $0x1e0] ss:$24 sps:$4 sm:$0xff]  }
  0xa7   :  { %815 = vmatprep.subr.bf16.mxu0 %v2450_v24 }
  0xa8   :  { %1063 = vmatpush1.bf16.msra.mxu1 %v2493_v57  ;;  %v3018_v24 = vsub.s32 0, %v3015_v23  ;;  %v2544_v57 = vld [vmem:[#allocation10] ss:$8 sps:$4 sm:$0xff]  }
  0xa9   :  { %1064 = vmatprep.subr.bf16.mxu1 %v2498_v58  ;;  %v2547_v58 = vld [vmem:[#allocation11 + $0x150] ss:$24 sps:$4 sm:$0xff]  }
  0xaa   :  { %816 = vmatpush1.bf16.msra.mxu0 %v2448_v25  ;;  %v227_v25 = vld [vmem:[%s3064_s3] sm:$0x3] }
  0xab   :  { %817 = vmatprep.subr.bf16.mxu0 %v2453_v26  ;;  %v3024_v26 = vsub.s32 1, %v3015_v23 }
  0xac   :  { %1065 = vmatpush1.bf16.msra.mxu1 %v2496_v59  ;;  %v2549_v59 = vld [vmem:[#allocation11 + $0x154] ss:$24 sps:$4 sm:$0xff]  }
  0xad   :  { %1066 = vmatprep.subr.bf16.mxu1 %v2501_v60  ;;  %v2552_v60 = vld [vmem:[#allocation11 + $0x15c] ss:$24 sps:$4 sm:$0xff]  }
  0xae   :  { %818 = vmatpush2.bf16.msra.mxu0 %v2451_v27  ;;  %v232_v27 = vrot.slane %v227_v25, %v3018_v24 }
  0xaf   :  { %819 = vmatprep.subr.bf16.mxu0 %v2456_v28  ;;  %v236_v28 = vrot.slane %v227_v25, %v3024_v26  ;;  %v878_v25 = vld [vmem:[%s3066_s5] sm:$0x3] }
  0xb0   :  { %1067 = vmatpush2.bf16.msra.mxu1 %v2499_v61  ;;  %v2555_v61 = vld [vmem:[#allocation11 + $0x124] ss:$24 sps:$4 sm:$0xff]  }
  0xb1   :  { %1068 = vmatprep.subr.bf16.mxu1 %v2504_v62  ;;  %v2553_v62 = vld [vmem:[#allocation11 + $0x120] ss:$24 sps:$4 sm:$0xff]  }
  0xb2   :  { %820 = vmatpush2.bf16.msra.mxu0 %v2454_v29 }
  0xb3   :  { %821 = vmatprep.subr.bf16.mxu0 %v2459_v30 }
  0xb4   :  { %1069 = vmatpush2.bf16.msra.mxu1 %v2502_v63  ;;  %v2561_v63 = vld [vmem:[#allocation11 + $0xf4] ss:$24 sps:$4 sm:$0xff]  }
  0xb5   :  { %1070 = vmatprep.subr.bf16.mxu1 %v2507_v0  ;;  %v2559_v0 = vld [vmem:[#allocation11 + $0xf0] ss:$24 sps:$4 sm:$0xff]  }
  0xb6   :  { %822 = vmatpush2.bf16.msra.mxu0 %v2457_v31 }
  0xb7   :  { %823 = vmatprep.subr.bf16.mxu0 %v2462_v32 }
  0xb8   :  { %1071 = vmatpush2.bf16.msra.mxu1 %v2505_v1  ;;  %v2567_v1 = vld [vmem:[#allocation11 + $0xc4] ss:$24 sps:$4 sm:$0xff]  }
  0xb9   :  { %1072 = vmatprep.subr.bf16.mxu1 %v2510_v2  ;;  %v2565_v2 = vld [vmem:[#allocation11 + $0xc0] ss:$24 sps:$4 sm:$0xff]  }
  0xba   :  { %824 = vmatpush2.bf16.msra.mxu0 %v2460_v33 }
  0xbb   :  { %825 = vmatprep.subr.bf16.mxu0 %v2465_v34 }
  0xbc   :  { %1073 = vmatpush2.bf16.msra.mxu1 %v2508_v3  ;;  %v2573_v3 = vld [vmem:[#allocation11 + $0x94] ss:$24 sps:$4 sm:$0xff]  }
  0xbd   :  { %1074 = vmatprep.subr.bf16.mxu1 %v2513_v4  ;;  %v2571_v4 = vld [vmem:[#allocation11 + $0x90] ss:$24 sps:$4 sm:$0xff]  }
  0xbe   :  { %826 = vmatpush2.bf16.msra.mxu0 %v2463_v35 }
  0xbf   :  { %827 = vmatprep.subr.bf16.mxu0 %v2468_v36 }
  0xc0   :  { %1075 = vmatpush2.bf16.msra.mxu1 %v2511_v5  ;;  %v2579_v5 = vld [vmem:[#allocation11 + $0x64] ss:$24 sps:$4 sm:$0xff]  }
  0xc1   :  { %1076 = vmatprep.subr.bf16.mxu1 %v2516_v6  ;;  %v2577_v6 = vld [vmem:[#allocation11 + $0x60] ss:$24 sps:$4 sm:$0xff]  }
  0xc2   :  { %828 = vmatpush2.bf16.msra.mxu0 %v2466_v37 }
  0xc3   :  { %829 = vmatprep.subr.bf16.mxu0 %v2471_v38 }
  0xc4   :  { %1077 = vmatpush2.bf16.msra.mxu1 %v2514_v7  ;;  %v2585_v7 = vld [vmem:[#allocation11 + $0x34] ss:$24 sps:$4 sm:$0xff]  }
  0xc5   :  { %1078 = vmatprep.subr.bf16.mxu1 %v2519_v8  ;;  %v2583_v8 = vld [vmem:[#allocation11 + $0x30] ss:$24 sps:$4 sm:$0xff]  }
  0xc6   :  { %830 = vmatpush2.bf16.msra.mxu0 %v2469_v39 }
  0xc7   :  { %831 = vmatprep.subr.bf16.mxu0 %v2474_v40 }
  0xc8   :  { %1079 = vmatpush2.bf16.msra.mxu1 %v2517_v9  ;;  %v2591_v9 = vld [vmem:[#allocation11 + $0x4] ss:$24 sps:$4 sm:$0xff]  }
  0xc9   :  { %1080 = vmatprep.subr.bf16.mxu1 %v2522_v10  ;;  %v2589_v10 = vld [vmem:[#allocation11] ss:$24 sps:$4 sm:$0xff]  }
  0xca   :  { %832 = vmatpush2.bf16.msra.mxu0 %v2472_v41 }
  0xcb   :  { %1206 = vmatprep.subr.bf16.mxu0 %v2525_v13  ;;  %v2603_v13 = vld [vmem:[#allocation11 + $0x2a4] ss:$24 sps:$4 sm:$0xff]  }
  0xcc   :  { %1081 = vmatpush2.bf16.msra.mxu1 %v2520_v11  ;;  %v2597_v11 = vld [vmem:[#allocation11 + $0x2d4] ss:$24 sps:$4 sm:$0xff]  }
  0xcd   :  { %834 = vmatmul.mubr.bf16.vlgmr.msra.gmra.mxu0 %v129_v43  ;;  %v2528_v43 = vld [vmem:[#allocation10 + $0x64] ss:$8 sps:$4 sm:$0xff]   ;;  %1859 = vmatprep.subr.bf16.mxu1 %v2549_v59 }
  0xce   :  { %1207 = vmatpush1.bf16.msra.mxu0 %v2523_v12  ;;  %1238 = vmatprep.mubr.bf16.mxu0 %v2919_v52  ;;  %v2595_v12 = vld [vmem:[#allocation11 + $0x2d0] ss:$24 sps:$4 sm:$0xff]   ;;  %v2606_v59 = vld [vmem:[#allocation11 + $0x2ac] ss:$24 sps:$4 sm:$0xff]  }
  0xcf   :  { %1208 = vmatprep.subr.bf16.mxu0 %v2528_v43  ;;  %v2558_v43 = vld [vmem:[#allocation11 + $0x12c] ss:$24 sps:$4 sm:$0xff]   ;;  %v2580_v52 = vld [vmem:[#allocation11 + $0x68] ss:$24 sps:$4 sm:$0xff]  }
  0xd2   :  { %1209 = vmatpush1.bf16.msra.mxu0 %v2526_v44  ;;  %v2556_v44 = vld [vmem:[#allocation11 + $0x128] ss:$24 sps:$4 sm:$0xff]  }
  0xd3   :  { %1210 = vmatprep.subr.bf16.mxu0 %v2531_v45  ;;  %v2564_v45 = vld [vmem:[#allocation11 + $0xfc] ss:$24 sps:$4 sm:$0xff]  }
  0xd6   :  { %1211 = vmatpush1.bf16.msra.mxu0 %v2529_v46  ;;  %v2562_v46 = vld [vmem:[#allocation11 + $0xf8] ss:$24 sps:$4 sm:$0xff]  }
  0xd7   :  { %1212 = vmatprep.subr.bf16.mxu0 %v2534_v47  ;;  %v2570_v47 = vld [vmem:[#allocation11 + $0xcc] ss:$24 sps:$4 sm:$0xff]  }
  0xda   :  { %1213 = vmatpush1.bf16.msra.mxu0 %v2532_v48  ;;  %v2568_v48 = vld [vmem:[#allocation11 + $0xc8] ss:$24 sps:$4 sm:$0xff]  }
  0xdb   :  { %1214 = vmatprep.subr.bf16.mxu0 %v2537_v49  ;;  %v2576_v49 = vld [vmem:[#allocation11 + $0x9c] ss:$24 sps:$4 sm:$0xff]  }
  0xde   :  { %1215 = vmatpush1.bf16.msra.mxu0 %v2535_v50  ;;  %v2574_v50 = vld [vmem:[#allocation11 + $0x98] ss:$24 sps:$4 sm:$0xff]  }
  0xdf   :  { %1216 = vmatprep.subr.bf16.mxu0 %v2540_v51  ;;  %v2582_v51 = vld [vmem:[#allocation11 + $0x6c] ss:$24 sps:$4 sm:$0xff]  }
  0xe2   :  { %1217 = vmatpush1.bf16.msra.mxu0 %v2538_v53  ;;  %v2588_v53 = vld [vmem:[#allocation11 + $0x3c] ss:$24 sps:$4 sm:$0xff]  }
  0xe3   :  { %1218 = vmatprep.subr.bf16.mxu0 %v2543_v54  ;;  %v2586_v54 = vld [vmem:[#allocation11 + $0x38] ss:$24 sps:$4 sm:$0xff]  }
  0xe6   :  { %1219 = vmatpush1.bf16.msra.mxu0 %v2541_v55  ;;  %v2594_v55 = vld [vmem:[#allocation11 + $0xc] ss:$24 sps:$4 sm:$0xff]  }
  0xe7   :  { %1220 = vmatprep.subr.bf16.mxu0 %v2546_v56  ;;  %v2592_v56 = vld [vmem:[#allocation11 + $0x8] ss:$24 sps:$4 sm:$0xff]  }
  0xea   :  { %1221 = vmatpush1.bf16.msra.mxu0 %v2544_v57  ;;  %v2600_v57 = vld [vmem:[#allocation11 + $0x2dc] ss:$24 sps:$4 sm:$0xff]  }
  0xeb   :  { %1900 = vmatprep.subr.bf16.mxu0 %v2552_v60  ;;  %v2604_v60 = vld [vmem:[#allocation11 + $0x2a8] ss:$24 sps:$4 sm:$0xff]  }
 0x14d   :  { %v753_v14 = vpop.f32.mrf.mxu0 }
 0x14e   :  { %v794_v16 = vpop.f32.mrf.mxu1  ;;  %v754_v29 = vadd.f32 %v753_v14, %v232_v27  ;;  %v2601_v14 = vld [vmem:[#allocation11 + $0x2a0] ss:$24 sps:$4 sm:$0xff]   ;;  %v883_v27 = vrot.slane %v878_v25, %v3018_v24 }
 0x14f   :  { %v755_v15 = vpop.f32.mrf.mxu0 }
 0x150   :  { %v796_v18 = vpop.f32.mrf.mxu1  ;;  %v756_v30 = vadd.f32 %v755_v15, %v236_v28  ;;  %v795_v31 = vadd.f32 %v794_v16, %v754_v29  ;;  %v2609_v15 = vld [vmem:[#allocation11 + $0x274] ss:$24 sps:$4 sm:$0xff]   ;;  %v2607_v16 = vld [vmem:[#allocation11 + $0x270] ss:$24 sps:$4 sm:$0xff]   ;;  %v887_v28 = vrot.slane %v878_v25, %v3024_v26 }
 0x151   :  { %v757_v17 = vpop.f32.mrf.mxu0 }
 0x152   :  { %v798_v20 = vpop.f32.mrf.mxu1  ;;  %v797_v33 = vadd.f32 %v796_v18, %v756_v30  ;;  %v2615_v17 = vld [vmem:[#allocation11 + $0x244] ss:$24 sps:$4 sm:$0xff]   ;;  %v2613_v18 = vld [vmem:[#allocation11 + $0x240] ss:$24 sps:$4 sm:$0xff]  }
 0x153   :  { %v758_v19 = vpop.f32.mrf.mxu0  ;;  %v2619_v20 = vld [vmem:[#allocation11 + $0x210] ss:$24 sps:$4 sm:$0xff]  }
 0x154   :  { %v799_v21 = vpop.f32.mrf.mxu1  ;;  %v2621_v19 = vld [vmem:[#allocation11 + $0x214] ss:$24 sps:$4 sm:$0xff]  }
 0x155   :  { %v2627_v21 = vld [vmem:[#allocation11 + $0x1e4] ss:$24 sps:$4 sm:$0xff]  }
 0x18d   :  { %v835_v32 = vpop.f32.mrf.mxu0 }
 0x18e   :  { %v836_v34 = vadd.f32 %v835_v32, %v795_v31 }
 0x18f   :  { %v837_v35 = vpop.f32.mrf.mxu0 }
 0x190   :  { %v838_v36 = vadd.f32 %v837_v35, %v797_v33  ;;  %v842_v37 = vmax.f32 %v836_v34, 0.0 }
 0x191   :  { %v839_v38 = vpop.f32.mrf.mxu0 }
 0x192   :  { %v843_v39 = vmax.f32 %v838_v36, 0.0  ;;  %v844_v42 = vpack.c.bf16 %v842_v37, %v842_v37  ;;  %v1094_v37 = vld [vmem:[#allocation5] sm:$0xff] }
 0x193   :  { %v840_v40 = vpop.f32.mrf.mxu0 }
 0x194   :  { %v845_v41 = vpack.c.bf16 %v843_v39, %v843_v39 }
 0x196   :  { %1082 = vmatprep.mubr.bf16.mxu1 %v845_v41  ;;  %v2550_v41 = vld [vmem:[#allocation11 + $0x158] ss:$24 sps:$4 sm:$0xff]  }
 0x197   :  { %1083 = vmatmul.mubr.bf16.vlgmr.msra.gmra.mxu1 %v844_v42 }
 0x198   :  { %1860 = vmatpush1.bf16.msra.mxu1 %v2547_v58  ;;  %v2598_v58 = vld [vmem:[#allocation11 + $0x2d8] ss:$24 sps:$4 sm:$0xff]  }
 0x199   :  { %1861 = vmatprep.subr.bf16.mxu1 %v2555_v61  ;;  %v2612_v61 = vld [vmem:[#allocation11 + $0x27c] ss:$24 sps:$4 sm:$0xff]  }
 0x19c   :  { %1862 = vmatpush1.bf16.msra.mxu1 %v2553_v62  ;;  %v2610_v62 = vld [vmem:[#allocation11 + $0x278] ss:$24 sps:$4 sm:$0xff]  }
 0x19d   :  { %1863 = vmatprep.subr.bf16.mxu1 %v2561_v63  ;;  %v2618_v63 = vld [vmem:[#allocation11 + $0x24c] ss:$24 sps:$4 sm:$0xff]  }
 0x1a0   :  { %1864 = vmatpush1.bf16.msra.mxu1 %v2559_v0  ;;  %v2616_v0 = vld [vmem:[#allocation11 + $0x248] ss:$24 sps:$4 sm:$0xff]  }
 0x1a1   :  { %1865 = vmatprep.subr.bf16.mxu1 %v2567_v1  ;;  %v2624_v1 = vld [vmem:[#allocation11 + $0x21c] ss:$24 sps:$4 sm:$0xff]  }
 0x1a4   :  { %1866 = vmatpush1.bf16.msra.mxu1 %v2565_v2  ;;  %v2622_v2 = vld [vmem:[#allocation11 + $0x218] ss:$24 sps:$4 sm:$0xff]  }
 0x1a5   :  { %1867 = vmatprep.subr.bf16.mxu1 %v2573_v3  ;;  %v2630_v3 = vld [vmem:[#allocation11 + $0x1ec] ss:$24 sps:$4 sm:$0xff]  }
 0x1a8   :  { %1868 = vmatpush1.bf16.msra.mxu1 %v2571_v4  ;;  %v2628_v4 = vld [vmem:[#allocation11 + $0x1e8] ss:$24 sps:$4 sm:$0xff]  }
 0x1a9   :  { %1869 = vmatprep.subr.bf16.mxu1 %v2579_v5  ;;  %v2633_v5 = vld [vmem:[#allocation11 + $0x1b4] ss:$24 sps:$4 sm:$0xff]  }
 0x1ac   :  { %1870 = vmatpush1.bf16.msra.mxu1 %v2577_v6  ;;  %v2631_v6 = vld [vmem:[#allocation11 + $0x1b0] ss:$24 sps:$4 sm:$0xff]  }
 0x1ad   :  { %1871 = vmatprep.subr.bf16.mxu1 %v2585_v7  ;;  %v2636_v7 = vld [vmem:[#allocation11 + $0x1bc] ss:$24 sps:$4 sm:$0xff]  }
 0x1b0   :  { %1872 = vmatpush1.bf16.msra.mxu1 %v2583_v8  ;;  %v2634_v8 = vld [vmem:[#allocation11 + $0x1b8] ss:$24 sps:$4 sm:$0xff]  }
 0x1b1   :  { %1873 = vmatprep.subr.bf16.mxu1 %v2591_v9  ;;  %v2639_v9 = vld [vmem:[#allocation11 + $0x184] ss:$24 sps:$4 sm:$0xff]  }
 0x1b4   :  { %1874 = vmatpush1.bf16.msra.mxu1 %v2589_v10  ;;  %v2637_v10 = vld [vmem:[#allocation11 + $0x180] ss:$24 sps:$4 sm:$0xff]  }
 0x1b5   :  { %1875 = vmatprep.subr.bf16.mxu1 %v2597_v11  ;;  %v2642_v11 = vld [vmem:[#allocation11 + $0x18c] ss:$24 sps:$4 sm:$0xff]  }
 0x1b8   :  { %1876 = vmatpush2.bf16.msra.mxu1 %v2595_v12  ;;  %v2640_v12 = vld [vmem:[#allocation11 + $0x188] ss:$24 sps:$4 sm:$0xff]  }
 0x1b9   :  { %1877 = vmatprep.subr.bf16.mxu1 %v2603_v13  ;;  %v2645_v13 = vld [vmem:[#allocation11 + $0x164] ss:$24 sps:$4 sm:$0xff]  }
 0x1bc   :  { %1878 = vmatpush2.bf16.msra.mxu1 %v2601_v14  ;;  %v1114_v14 = vld [vmem:[%s3068_s7] sm:$0x3]  ;;  %s2920_s7 = smov [#allocation14]  }
 0x1bd   :  { %1879 = vmatprep.subr.bf16.mxu1 %v2609_v15  ;;  %v1119_v15 = vrot.slane %v1114_v14, %v3018_v24  ;;  %s2042_s1 = sshll.u32 %s2920_s7, 4  ;;  %s2043_s1 = int_to_ptr.vmem [resolvable:$true] %s2042_s1 }
 0x1be   :  { %s2837_s17 = scalar_lea.vmem %s2043_s1, 128  ;;  %p2842_p3 = scmp.lt.s32.totalorder %s2043_s1, %s2043_s1 }
 0x1bf   :  { %p2838_p2 = scmp.ne.s32.totalorder %s2043_s1, %s2837_s17  ;;  %p2843_p4 = scmp.lt.s32.totalorder %s2837_s17, %s2837_s17 }
 0x1c0   :  { %1880 = vmatpush2.bf16.msra.mxu1 %v2607_v16  ;;  %v1123_v16 = vrot.slane %v1114_v14, %v3024_v26 }
 0x1c1   :  { %1881 = vmatprep.subr.bf16.mxu1 %v2615_v17  ;;  %p2844_p5 = por %p2843_p4, %p2842_p3 }
 0x1c3   :  { %p2845_p6 = pnand %p2844_p5, %p2838_p2 }
 0x1c4   :  { %1882 = vmatpush2.bf16.msra.mxu1 %v2613_v18 }
 0x1c5   :  { %1883 = vmatprep.subr.bf16.mxu1 %v2621_v19 }
 0x1c8   :  { %1884 = vmatpush2.bf16.msra.mxu1 %v2619_v20 }
 0x1c9   :  { %1885 = vmatprep.subr.bf16.mxu1 %v2627_v21 }
 0x1cc   :  { %1886 = vmatpush2.bf16.msra.mxu1 %v2625_v22 }
 0x1cd   :  { %1887 = vmatprep.subr.bf16.mxu1 %v2633_v5 }
 0x1d0   :  { %1888 = vmatpush2.bf16.msra.mxu1 %v2631_v6 }
 0x1d1   :  { %1889 = vmatprep.subr.bf16.mxu1 %v2639_v9 }
 0x1d4   :  { %1890 = vmatpush2.bf16.msra.mxu1 %v2637_v10 }
 0x1d5   :  { %1941 = vmatprep.subr.bf16.mxu1 %v2645_v13 }
 0x257   :  { %v1084_v29 = vpop.f32.mrf.mxu1 }
 0x258   :  { %v1085_v30 = vadd.f32 %v1084_v29, %v883_v27  ;;  %v2643_v29 = vld [vmem:[#allocation11 + $0x160] ss:$24 sps:$4 sm:$0xff]  }
 0x259   :  { %v1086_v31 = vpop.f32.mrf.mxu1 }
 0x25a   :  { %2024 = vst [vmem:[#allocation14] sm:$0xff] %v1085_v30  ;;  %v1087_v32 = vadd.f32 %v1086_v31, %v887_v28  ;;  %v2648_v31 = vld [vmem:[#allocation11 + $0x134] ss:$24 sps:$4 sm:$0xff]  }
 0x25b   :  { %v1088_v33 = vpop.f32.mrf.mxu1 }
 0x25c   :  { %v1091_v34 = vmul.f32 0.5, %v1087_v32  ;;  %2025 = vst [vmem:[#allocation16] sm:$0xff] %v1087_v32  ;;  %v2646_v32 = vld [vmem:[#allocation11 + $0x130] ss:$24 sps:$4 sm:$0xff]   ;;  %v2651_v33 = vld [vmem:[#allocation11 + $0x104] ss:$24 sps:$4 sm:$0xff]  }
 0x25d   :  { %v1089_v35 = vpop.f32.mrf.mxu1 }
 0x25e   :  { %v1092_v36 = vmul.f32 1.442695, %v1091_v34  ;;  %v2649_v34 = vld [vmem:[#allocation11 + $0x100] ss:$24 sps:$4 sm:$0xff]   ;;  %v2654_v35 = vld [vmem:[#allocation11 + $0xd4] ss:$24 sps:$4 sm:$0xff]  }
 0x260   :  { %2691 = vpow2.f32 %v1092_v36  ;;  %v2652_v36 = vld [vmem:[#allocation11 + $0xd0] ss:$24 sps:$4 sm:$0xff]  }
 0x26d   :  { %v2692_v38 = vpop.eup %2691 }
 0x26e   :  { %v1095_v39 = vmul.f32 %v2692_v38, %v1094_v37  ;;  %v2657_v37 = vld [vmem:[#allocation11 + $0xa4] ss:$24 sps:$4 sm:$0xff]   ;;  %v2655_v38 = vld [vmem:[#allocation11 + $0xa0] ss:$24 sps:$4 sm:$0xff]  }
 0x270   :  { %v1096_v40 = vadd.f32 %v1095_v39, %v1085_v30  ;;  %v2660_v39 = vld [vmem:[#allocation11 + $0x74] ss:$24 sps:$4 sm:$0xff]  }
 0x272   :  { %v1097_v42 = vpack.c.bf16 %v1096_v40, %v1096_v40  ;;  %v2658_v40 = vld [vmem:[#allocation11 + $0x70] ss:$24 sps:$4 sm:$0xff]  }
 0x274   :  { %1239 = vmatmul.mubr.bf16.vlgmr.msra.gmra.mxu0 %v1097_v42  ;;  %v2661_v42 = vld [vmem:[#allocation11 + $0x40] ss:$24 sps:$4 sm:$0xff]  }
 0x275   :  { %1901 = vmatpush1.bf16.msra.mxu0 %v2550_v41  ;;  %v2663_v41 = vld [vmem:[#allocation11 + $0x44] ss:$24 sps:$4 sm:$0xff]  }
 0x276   :  { %1902 = vmatprep.subr.bf16.mxu0 %v2558_v43  ;;  %v2666_v43 = vld [vmem:[#allocation11 + $0x14] ss:$24 sps:$4 sm:$0xff]  }
 0x279   :  { %1903 = vmatpush1.bf16.msra.mxu0 %v2556_v44  ;;  %v2664_v44 = vld [vmem:[#allocation11 + $0x10] ss:$24 sps:$4 sm:$0xff]  }
 0x27a   :  { %1904 = vmatprep.subr.bf16.mxu0 %v2564_v45  ;;  %v2669_v45 = vld [vmem:[#allocation11 + $0x2e4] ss:$24 sps:$4 sm:$0xff]  }
 0x27d   :  { %1905 = vmatpush1.bf16.msra.mxu0 %v2562_v46  ;;  %v2667_v46 = vld [vmem:[#allocation11 + $0x2e0] ss:$24 sps:$4 sm:$0xff]  }
 0x27e   :  { %1906 = vmatprep.subr.bf16.mxu0 %v2570_v47  ;;  %v2672_v47 = vld [vmem:[#allocation11 + $0x2b4] ss:$24 sps:$4 sm:$0xff]  }
 0x281   :  { %1907 = vmatpush1.bf16.msra.mxu0 %v2568_v48  ;;  %v2670_v48 = vld [vmem:[#allocation11 + $0x2b0] ss:$24 sps:$4 sm:$0xff]  }
 0x282   :  { %1908 = vmatprep.subr.bf16.mxu0 %v2576_v49  ;;  %v2675_v49 = vld [vmem:[#allocation11 + $0x284] ss:$24 sps:$4 sm:$0xff]  }
 0x285   :  { %1909 = vmatpush1.bf16.msra.mxu0 %v2574_v50  ;;  %v2673_v50 = vld [vmem:[#allocation11 + $0x280] ss:$24 sps:$4 sm:$0xff]  }
 0x286   :  { %1910 = vmatprep.subr.bf16.mxu0 %v2582_v51  ;;  %v2678_v51 = vld [vmem:[#allocation11 + $0x254] ss:$24 sps:$4 sm:$0xff]  }
 0x289   :  { %1911 = vmatpush1.bf16.msra.mxu0 %v2580_v52  ;;  %v2676_v52 = vld [vmem:[#allocation11 + $0x250] ss:$24 sps:$4 sm:$0xff]  }
 0x28a   :  { %1912 = vmatprep.subr.bf16.mxu0 %v2588_v53  ;;  %v2681_v53 = vld [vmem:[#allocation11 + $0x224] ss:$24 sps:$4 sm:$0xff]  }
 0x28d   :  { %1913 = vmatpush1.bf16.msra.mxu0 %v2586_v54  ;;  %v2679_v54 = vld [vmem:[#allocation11 + $0x220] ss:$24 sps:$4 sm:$0xff]  }
 0x28e   :  { %1914 = vmatprep.subr.bf16.mxu0 %v2594_v55  ;;  %v2684_v55 = vld [vmem:[#allocation11 + $0x1f4] ss:$24 sps:$4 sm:$0xff]  }
 0x291   :  { %1915 = vmatpush1.bf16.msra.mxu0 %v2592_v56  ;;  %v2682_v56 = vld [vmem:[#allocation11 + $0x1f0] ss:$24 sps:$4 sm:$0xff]  }
 0x292   :  { %1916 = vmatprep.subr.bf16.mxu0 %v2600_v57  ;;  %v2687_v57 = vld [vmem:[#allocation11 + $0x1c4] ss:$24 sps:$4 sm:$0xff]  }
 0x295   :  { %1917 = vmatpush2.bf16.msra.mxu0 %v2598_v58  ;;  %v2685_v58 = vld [vmem:[#allocation11 + $0x1c0] ss:$24 sps:$4 sm:$0xff]  }
 0x296   :  { %1918 = vmatprep.subr.bf16.mxu0 %v2606_v59  ;;  %v2690_v59 = vld [vmem:[#allocation11 + $0x194] ss:$24 sps:$4 sm:$0xff]  }
 0x299   :  { %1919 = vmatpush2.bf16.msra.mxu0 %v2604_v60  ;;  %v2688_v60 = vld [vmem:[#allocation11 + $0x190] ss:$24 sps:$4 sm:$0xff]  }
 0x29a   :  { %1920 = vmatprep.subr.bf16.mxu0 %v2612_v61 }
 0x29d   :  { %1921 = vmatpush2.bf16.msra.mxu0 %v2610_v62 }
 0x29e   :  { %1922 = vmatprep.subr.bf16.mxu0 %v2618_v63 }
 0x2a1   :  { %1923 = vmatpush2.bf16.msra.mxu0 %v2616_v0 }
 0x2a2   :  { %1924 = vmatprep.subr.bf16.mxu0 %v2624_v1 }
 0x2a5   :  { %1925 = vmatpush2.bf16.msra.mxu0 %v2622_v2 }
 0x2a6   :  { %1926 = vmatprep.subr.bf16.mxu0 %v2630_v3 }
 0x2a9   :  { %1927 = vmatpush2.bf16.msra.mxu0 %v2628_v4 }
 0x2aa   :  { %1928 = vmatprep.subr.bf16.mxu0 %v2636_v7 }
 0x2ad   :  { %1929 = vmatpush2.bf16.msra.mxu0 %v2634_v8 }
 0x2ae   :  { %1930 = vmatprep.subr.bf16.mxu0 %v2642_v11 }
 0x2b1   :  { %1931 = vmatpush2.bf16.msra.mxu0 %v2640_v12 }
 0x334   :  { %v1240_v17 = vpop.f32.mrf.mxu0 }
 0x335   :  { %v1241_v18 = vadd.f32 %v1240_v17, %v1119_v15 }
 0x336   :  { %v1242_v19 = vpop.f32.mrf.mxu0 }
 0x337   :  { %v1243_v20 = vadd.f32 %v1242_v19, %v1123_v16  ;;  %v1247_v21 = vmax.f32 %v1241_v18, 0.0 }
 0x338   :  { %v1244_v22 = vpop.f32.mrf.mxu0 }
 0x339   :  { %v1248_v25 = vmax.f32 %v1243_v20, 0.0  ;;  %v3038_v30 = vpack.c.bf16 %v1247_v21, %v1247_v21 }
 0x33a   :  { %v1245_v27 = vpop.f32.mrf.mxu0 }
 0x33b   :  { %v1250_v28 = vpack.c.bf16 %v1248_v25, %v1248_v25 }
 0x33d   :  { %1891 = vmatprep.mubr.bf16.mxu1 %v1250_v28  ;;  %1932 = vmatprep.mubr.bf16.mxu0 %v1250_v28 }
 0x33e   :  { %1892 = vmatmul.mubr.bf16.vlgmr.msra.gmra.mxu1 %v3038_v30  ;;  %1933 = vmatmul.mubr.bf16.vlgmr.msra.gmra.mxu0 %v3038_v30 }
 0x33f   :  { %1942 = vmatpush1.bf16.msra.mxu1 %v2643_v29  ;;  %1973 = vmatprep.mubr.bf16.mxu1 %v1250_v28 }
 0x340   :  { %1943 = vmatprep.subr.bf16.mxu1 %v2648_v31 }
 0x343   :  { %1944 = vmatpush1.bf16.msra.mxu1 %v2646_v32 }
 0x344   :  { %1945 = vmatprep.subr.bf16.mxu1 %v2651_v33 }
 0x347   :  { %1946 = vmatpush1.bf16.msra.mxu1 %v2649_v34 }
 0x348   :  { %1947 = vmatprep.subr.bf16.mxu1 %v2654_v35 }
 0x34b   :  { %1948 = vmatpush1.bf16.msra.mxu1 %v2652_v36 }
 0x34c   :  { %1949 = vmatprep.subr.bf16.mxu1 %v2657_v37 }
 0x34f   :  { %1950 = vmatpush1.bf16.msra.mxu1 %v2655_v38 }
 0x350   :  { %1951 = vmatprep.subr.bf16.mxu1 %v2660_v39 }
 0x353   :  { %1952 = vmatpush1.bf16.msra.mxu1 %v2658_v40 }
 0x354   :  { %1953 = vmatprep.subr.bf16.mxu1 %v2663_v41 }
 0x357   :  { %1954 = vmatpush1.bf16.msra.mxu1 %v2661_v42 }
 0x358   :  { %1955 = vmatprep.subr.bf16.mxu1 %v2666_v43 }
 0x35b   :  { %1956 = vmatpush1.bf16.msra.mxu1 %v2664_v44 }
 0x35c   :  { %1957 = vmatprep.subr.bf16.mxu1 %v2669_v45 }
 0x35f   :  { %1958 = vmatpush2.bf16.msra.mxu1 %v2667_v46 }
 0x360   :  { %1959 = vmatprep.subr.bf16.mxu1 %v2672_v47 }
 0x363   :  { %1960 = vmatpush2.bf16.msra.mxu1 %v2670_v48 }
 0x364   :  { %1961 = vmatprep.subr.bf16.mxu1 %v2675_v49 }
 0x367   :  { %1962 = vmatpush2.bf16.msra.mxu1 %v2673_v50 }
 0x368   :  { %1963 = vmatprep.subr.bf16.mxu1 %v2678_v51 }
 0x36b   :  { %1964 = vmatpush2.bf16.msra.mxu1 %v2676_v52 }
 0x36c   :  { %1965 = vmatprep.subr.bf16.mxu1 %v2681_v53 }
 0x36f   :  { %1966 = vmatpush2.bf16.msra.mxu1 %v2679_v54 }
 0x370   :  { %1967 = vmatprep.subr.bf16.mxu1 %v2684_v55 }
 0x373   :  { %1968 = vmatpush2.bf16.msra.mxu1 %v2682_v56 }
 0x374   :  { %1969 = vmatprep.subr.bf16.mxu1 %v2687_v57 }
 0x377   :  { %1970 = vmatpush2.bf16.msra.mxu1 %v2685_v58 }
 0x378   :  { %1971 = vmatprep.subr.bf16.mxu1 %v2690_v59 }
 0x37b   :  { %1972 = vmatpush2.bf16.msra.mxu1 %v2688_v60 }
 0x37e   :  { %1974 = vmatmul.mubr.bf16.vlgmr.msra.gmra.mxu1 %v3038_v30 }
 0x37f   :  { %2848 = shalt.err (!%p2845_p6)
}
 0x380   :  { %2045 = dma.vmem_to_hbm [thread:$0]  %s2043_s1, 128, %s3072_s11, [#allocation15]  }
 0x381   :  { %s2921_s20 = smov [#allocation16]  }
 0x382   :  { %s2052_s21 = sshll.u32 %s2921_s20, 4  ;;  %s2053_s21 = int_to_ptr.vmem [resolvable:$true] %s2052_s21 }
 0x383   :  { %s2857_s22 = scalar_lea.vmem %s2053_s21, 128  ;;  %p2862_p8 = scmp.lt.s32.totalorder %s2053_s21, %s2053_s21 }
 0x384   :  { %p2858_p7 = scmp.ne.s32.totalorder %s2053_s21, %s2857_s22  ;;  %p2863_p9 = scmp.lt.s32.totalorder %s2857_s22, %s2857_s22 }
 0x386   :  { %p2864_p10 = por %p2863_p9, %p2862_p8 }
 0x388   :  { %p2865_p11 = pnand %p2864_p10, %p2858_p7 }
 0x38a   :  { %2868 = shalt.err (!%p2865_p11)
}
 0x38b   :  { %2055 = dma.vmem_to_hbm [thread:$0]  %s2053_s21, 128, %s3073_s12, [#allocation15]   ;;  %v1359_v61 = vsub.s32 2, %v3015_v23  ;;  %v1347_v62 = vld [vmem:[%s3070_s9] sm:$0x3f]  ;;  %v1363_v63 = vsub.s32 3, %v3015_v23 }
 0x38c   :  { %v1352_v0 = vrot.slane %v1347_v62, %v3018_v24  ;;  %v1356_v2 = vrot.slane %v1347_v62, %v3024_v26  ;;  %v1367_v33 = vsub.s32 4, %v3015_v23  ;;  %v1371_v34 = vsub.s32 5, %v3015_v23  ;;  %s2922_s9 = smov [#allocation13]  }
 0x38d   :  { %v1360_v1 = vrot.slane %v1347_v62, %v1359_v61  ;;  %v1364_v3 = vrot.slane %v1347_v62, %v1363_v63  ;;  %s2032_s11 = sshll.u32 %s2922_s9, 4  ;;  %s2033_s11 = int_to_ptr.vmem [resolvable:$true] %s2032_s11 }
 0x38e   :  { %v1368_v35 = vrot.slane %v1347_v62, %v1367_v33  ;;  %v1372_v36 = vrot.slane %v1347_v62, %v1371_v34  ;;  %s2877_s12 = scalar_lea.vmem %s2033_s11, 768  ;;  %p2882_p13 = scmp.lt.s32.totalorder %s2033_s11, %s2033_s11 }
 0x38f   :  { %p2878_p12 = scmp.ne.s32.totalorder %s2033_s11, %s2877_s12  ;;  %p2883_p0 = scmp.lt.s32.totalorder %s2877_s12, %s2877_s12 }
 0x391   :  { %p2884_p1 = por %p2883_p0, %p2882_p13 }
 0x393   :  { %p2885_p2 = pnand %p2884_p1, %p2878_p12 }
 0x3fe   :  { %v1893_v4 = vpop.f32.mrf.mxu1  ;;  %v1934_v5 = vpop.f32.mrf.mxu0 }
 0x3ff   :  { %v1894_v6 = vadd.f32 %v1893_v4, %v1352_v0  ;;  %v1935_v7 = vadd.f32 %v1934_v5, %v1360_v1 }
 0x400   :  { %v1895_v8 = vpop.f32.mrf.mxu1  ;;  %v1936_v9 = vpop.f32.mrf.mxu0 }
 0x401   :  { %v2311_v10 = vmul.f32 -1.442695, %v1894_v6  ;;  %v2313_v11 = vmul.f32 -1.442695, %v1935_v7  ;;  %v1896_v12 = vadd.f32 %v1895_v8, %v1356_v2  ;;  %v1937_v13 = vadd.f32 %v1936_v9, %v1364_v3 }
 0x402   :  { %v1897_v14 = vpop.f32.mrf.mxu1  ;;  %v1938_v15 = vpop.f32.mrf.mxu0 }
 0x403   :  { %2693 = vpow2.f32 %v2311_v10  ;;  %v2312_v16 = vmul.f32 -1.442695, %v1896_v12  ;;  %v2314_v17 = vmul.f32 -1.442695, %v1937_v13 }
 0x404   :  { %2695 = vpow2.f32 %v2313_v11  ;;  %v1898_v24 = vpop.f32.mrf.mxu1  ;;  %v1939_v18 = vpop.f32.mrf.mxu0 }
 0x405   :  { %2697 = vpow2.f32 %v2312_v16 }
 0x406   :  { %2699 = vpow2.f32 %v2314_v17 }
 0x410   :  { %v2694_v26 = vpop.eup %2693 }
 0x411   :  { %v2696_v19 = vpop.eup %2695  ;;  %v2000_v20 = vadd.f32 1.0, %v2694_v26 }
 0x412   :  { %v2698_v21 = vpop.eup %2697  ;;  %v2002_v22 = vadd.f32 1.0, %v2696_v19 }
 0x413   :  { %v2700_v25 = vpop.eup %2699  ;;  %2701 = vrcp.f32 %v2000_v20  ;;  %v2001_v27 = vadd.f32 1.0, %v2698_v21 }
 0x414   :  { %2703 = vrcp.f32 %v2002_v22  ;;  %v2003_v28 = vadd.f32 1.0, %v2700_v25 }
 0x415   :  { %2705 = vrcp.f32 %v2001_v27 }
 0x416   :  { %2707 = vrcp.f32 %v2003_v28 }
 0x420   :  { %v2702_v29 = vpop.eup %2701 }
 0x421   :  { %v2704_v30 = vpop.eup %2703  ;;  %2018 = vst [vmem:[#allocation13] sm:$0xff] %v2702_v29 }
 0x422   :  { %v2706_v31 = vpop.eup %2705  ;;  %2020 = vst [vmem:[#allocation13 + $0x10] sm:$0xff] %v2704_v30 }
 0x423   :  { %v2708_v32 = vpop.eup %2707  ;;  %2019 = vst [vmem:[#allocation13 + $0x8] sm:$0xff] %v2706_v31 }
 0x424   :  { %2021 = vst [vmem:[#allocation13 + $0x18] sm:$0xff] %v2708_v32 }
 0x43e   :  { %v1975_v37 = vpop.f32.mrf.mxu1 }
 0x43f   :  { %v1976_v38 = vadd.f32 %v1975_v37, %v1368_v35 }
 0x440   :  { %v1977_v39 = vpop.f32.mrf.mxu1 }
 0x441   :  { %v2315_v40 = vmul.f32 -1.442695, %v1976_v38  ;;  %v1978_v41 = vadd.f32 %v1977_v39, %v1372_v36 }
 0x442   :  { %v1979_v42 = vpop.f32.mrf.mxu1 }
 0x443   :  { %2709 = vpow2.f32 %v2315_v40  ;;  %v2316_v43 = vmul.f32 -1.442695, %v1978_v41 }
 0x444   :  { %v1980_v44 = vpop.f32.mrf.mxu1 }
 0x445   :  { %2711 = vpow2.f32 %v2316_v43 }
 0x450   :  { %v2710_v45 = vpop.eup %2709 }
 0x451   :  { %v2004_v46 = vadd.f32 1.0, %v2710_v45 }
 0x452   :  { %v2712_v47 = vpop.eup %2711 }
 0x453   :  { %2713 = vrcp.f32 %v2004_v46  ;;  %v2005_v48 = vadd.f32 1.0, %v2712_v47 }
 0x455   :  { %2715 = vrcp.f32 %v2005_v48 }
 0x460   :  { %v2714_v23 = vpop.eup %2713 }
 0x461   :  { %2022 = vst [vmem:[#allocation13 + $0x20] sm:$0xff] %v2714_v23 }
 0x462   :  { %v2716_v49 = vpop.eup %2715 }
 0x463   :  { %2023 = vst [vmem:[#allocation13 + $0x28] sm:$0xff] %v2716_v49 }
 0x464   :  { %2888 = shalt.err (!%p2885_p2)
}
 0x465   :  { %2035 = dma.vmem_to_hbm [thread:$0]  %s2033_s11, 768, %s3071_s10, [#allocation4]  }
 0x466   :  { %2905 = dma.done.wait [#allocation4], 768  }
 0x467   :  { %2906 = vsyncadd [#allocation4], 4294966528 }
 0x468   :  { %2907 = dma.done.wait [#allocation15], 256  }
 0x469   :  { %2908 = vsyncadd [#allocation15], 4294967040 }
 0x46a   :  { %2065 = vsyncpa [#allocation3], 1 }
 0x46b   :  { %2066 = vsyncpa [#allocation6], 1 }
 0x46c   :  { %2067 = vsyncpa [#allocation9], 1 }
 0x46d   :  { %2068 = vsyncpa [#allocation12], 1 }
 0x46e   :  { %2069 = vsyncpa [#allocation4], 1 }
 0x46f   :  { %2070 = vsyncpa [#allocation15], 1 }

</bundles_post_ra>
